<compile_context>
chip_gen: v7x
topology: tpu7x:2x2x1
jax: 0.10.0
libtpu: 0.0.40
codegen_flags: <defaults>
</compile_context>

<pallas_src>
import jax
import jax.numpy as jnp
import numpy as np
from jax import lax
from jax.experimental import pallas as pl
from jax.experimental.pallas import tpu as pltpu


def _layernorm_nhwc(x, w, b, eps=1e-5):
    # channels-last Restormer 'WithBias' LayerNorm (used by the pure-JAX reference).
    mu = jnp.mean(x, axis=-1, keepdims=True)
    var = jnp.mean((x - mu) ** 2, axis=-1, keepdims=True)
    return (x - mu) / jnp.sqrt(var + eps) * w + b


def _layernorm_cf(x, w, b, eps=1e-5):
    # channels-first (C, HW) LayerNorm over the channel (sublane) axis.
    mu = jnp.mean(x, axis=0, keepdims=True)
    var = jnp.mean((x - mu) ** 2, axis=0, keepdims=True)
    return (x - mu) * lax.rsqrt(var + eps) * w + b


def _round_up(v, m):
    return (v + m - 1) // m * m


def _make_kernel(H, W, C_in, C_out, Wf, HWf, LY, KOFF):
    C4 = C_out // 4
    taps5 = [(dy, dx) for dy in range(5) for dx in range(5)]
    taps3 = [(dy, dx) for dy in range(3) for dx in range(3)]

    def kernel(x_ref, wc_ref, w2_ref, mask_ref,
               b1_ref, b2_ref, b3_ref, alpha_ref,
               ln1w_ref, ln1b_ref, ln2w_ref, ln2b_ref, dbias_ref,
               out_ref, p1_ref, p2_ref, yf_ref):
        # ---- im2col for conv1 (5x5) and conv3 (3x3, embedded) -> one MXU matmul
        # Static Python unroll: every tap slice has a compile-time lane offset.
        for t, (dy, dx) in enumerate(taps5):
            off = dy * Wf + dx
            p1_ref[t * C_in:(t + 1) * C_in, :] = x_ref[0, :, off:off + HWf]
        r = jnp.dot(wc_ref[...], p1_ref[...],
                    preferred_element_type=jnp.float32)        # (C_out + C4, HWf)

        acc1 = r[:C_out, :] + b1_ref[...]                       # conv1 output
        acc3 = r[C_out:C_out + C4, :] + b3_ref[...]             # conv3 output

        # branch: LayerNorm(C4)
        x2 = _layernorm_cf(acc3, ln1w_ref[...], ln1b_ref[...])

        # main: LayerNorm(C_out) -> PReLU (per-channel slope)
        y = _layernorm_cf(acc1, ln2w_ref[...], ln2b_ref[...])
        alpha = alpha_ref[...]
        y = jnp.where(y > 0, y, alpha * y)

        # zero the junk columns (w >= W) so they double as conv2's zero padding
        y = y * mask_ref[...]

        # frame y with zero strips above/below.  The strips are re-zeroed every
        # step (two aligned (C_out, 128) stores): cheap, and keeps the
        # "parallel" grid semantics free of any cross-iteration scratch state.
        yf_ref[:, 0:KOFF] = jnp.zeros((C_out, KOFF), jnp.float32)
        yf_ref[:, KOFF:KOFF + HWf] = y
        yf_ref[:, KOFF + HWf:LY] = jnp.zeros((C_out, LY - KOFF - HWf), jnp.float32)

        # ---- im2col for conv2 (3x3 over the zero-framed y) -> one MXU matmul
        for t, (dy, dx) in enumerate(taps3):
            off = KOFF + (dy - 1) * Wf + (dx - 1)
            p2_ref[t * C_out:(t + 1) * C_out, :] = yf_ref[:, off:off + HWf]
        c2 = jnp.dot(w2_ref[...], p2_ref[...],
                     preferred_element_type=jnp.float32)        # (C4, HWf)
        c2 = c2 + b2_ref[...]

        # fuse: x_2 * conv2_out + bias   (lane-dense (C4, HWf) store)
        out_ref[0] = x2 * c2 + dbias_ref[...]

    return kernel


def depth_transform_encoder(x_nchw, params):
    N, C_in, H, W = x_nchw.shape
    C_out = params["w1_4d"].shape[-1]
    C4 = C_out // 4

    # Flattened-frame geometry: width padded by the 5x5 halo (2 each side),
    # rounded to a sublane multiple so H*Wf lands on a lane-friendly size.
    Wf = _round_up(W + 4, 8)
    Hf = H + 4
    HWf = H * Wf
    Lx = _round_up(Hf * Wf + 4, 128)        # max tap slice reaches Hf*Wf + 4
    KOFF = 128                              # lane offset of y inside its frame
    LY = _round_up(KOFF + (H + 1) * Wf + 1, 128)

    # Input: NCHW (already channels-first) -> zero-framed, spatially flattened.
    x = x_nchw.astype(jnp.float32)
    xf = jnp.pad(x, ((0, 0), (0, 0), (2, 2), (2, Wf - W - 2)))   # (N, C_in, Hf, Wf)
    xf = jnp.pad(xf.reshape(N, C_in, Hf * Wf),
                 ((0, 0), (0, 0), (0, Lx - Hf * Wf)))            # (N, C_in, Lx)

    # Weights in channels-first matmul form (contracting dim = tap-major, ch-minor).
    w1m = params["w1_4d"].reshape(25 * C_in, C_out).T            # (C_out, 25*C_in)
    w3m = jnp.pad(params["w3_4d"], ((1, 1), (1, 1), (0, 0), (0, 0)))
    w3m = w3m.reshape(25 * C_in, C4).T                           # (C4, 25*C_in)
    wc = jnp.concatenate([w1m, w3m], axis=0)                     # (C_out+C4, 25*C_in)
    w2m = params["w2_4d"].reshape(9 * C_out, C4).T               # (C4, 9*C_out)

    # valid-column mask: 1 where w < W inside each Wf-wide frame row
    mask = jnp.asarray((np.arange(HWf) % Wf < W).astype(np.float32)).reshape(1, HWf)

    cf = lambda a: jnp.asarray(a, jnp.float32).reshape(-1, 1)    # (C, 1) column
    b1, b2, b3 = cf(params["b1"]), cf(params["b2"]), cf(params["b3"])
    alpha = cf(params["prelu_alpha"])
    ln1w, ln1b = cf(params["ln1_w"]), cf(params["ln1_b"])
    ln2w, ln2b = cf(params["ln2_w"]), cf(params["ln2_b"])
    dbias = cf(params["dbias"])

    def full(arr):
        nd = arr.ndim
        return pl.BlockSpec(arr.shape, lambda n, _nd=nd: (0,) * _nd)

    kernel = _make_kernel(H, W, C_in, C_out, Wf, HWf, LY, KOFF)
    grid_spec = pltpu.PrefetchScalarGridSpec(
        num_scalar_prefetch=0,
        grid=(N,),
        in_specs=[
            pl.BlockSpec((1, C_in, Lx), lambda n: (n, 0, 0)),
            full(wc), full(w2m), full(mask),
            full(b1), full(b2), full(b3), full(alpha),
            full(ln1w), full(ln1b), full(ln2w), full(ln2b), full(dbias),
        ],
        out_specs=pl.BlockSpec((1, C4, HWf), lambda n: (n, 0, 0)),
        scratch_shapes=[
            pltpu.VMEM((25 * C_in, HWf), jnp.float32),   # conv1/conv3 im2col patches
            pltpu.VMEM((9 * C_out, HWf), jnp.float32),   # conv2 im2col patches
            pltpu.VMEM((C_out, LY), jnp.float32),        # zero-framed y for conv2
        ],
    )
    pre = pl.pallas_call(
        kernel,
        out_shape=jax.ShapeDtypeStruct((N, C4, HWf), jnp.float32),
        grid_spec=grid_spec,
        compiler_params=pltpu.CompilerParams(
            dimension_semantics=("parallel",),           # batch elems independent
            vmem_limit_bytes=32 * 1024 * 1024),
    )(xf, wc, w2m, mask, b1, b2, b3, alpha, ln1w, ln1b, ln2w, ln2b, dbias)

    # TODO(synk): for large frames add an H-row-block grid axis (2-row halo) and
    # fold PixelUnshuffle into the out_spec; at these sizes the glue is negligible.
    o = pre.reshape(N, C4, H, Wf)[:, :, :, :W]           # drop frame junk columns
    o = o.reshape(N, C4, H // 2, 2, W // 2, 2)
    o = jnp.transpose(o, (0, 1, 3, 5, 2, 4))             # PixelUnshuffle(2)
    return o.reshape(N, C4 * 4, H // 2, W // 2)


def init_params(key, in_channel, out_channel):
    C4 = out_channel // 4
    ks = jax.random.split(key, 7)
    p = {
        # conv weights kept in HWIO (synthetic deterministic init)
        "w1_4d": 0.1 * jax.random.normal(ks[0], (5, 5, in_channel, out_channel), jnp.float32),
        "b1": 0.1 * jax.random.normal(ks[1], (1, out_channel), jnp.float32),
        "w2_4d": 0.1 * jax.random.normal(ks[2], (3, 3, out_channel, C4), jnp.float32),
        "b2": 0.1 * jax.random.normal(ks[3], (1, C4), jnp.float32),
        "w3_4d": 0.1 * jax.random.normal(ks[4], (3, 3, in_channel, C4), jnp.float32),
        "b3": 0.1 * jax.random.normal(ks[5], (1, C4), jnp.float32),
        "dbias": jax.random.normal(ks[6], (1, C4), jnp.float32),       # nn.Parameter(randn)
        "prelu_alpha": jnp.full((1, out_channel), 0.25, jnp.float32),   # PReLU default init
        "ln1_w": jnp.ones((1, C4), jnp.float32),
        "ln1_b": jnp.zeros((1, C4), jnp.float32),
        "ln2_w": jnp.ones((1, out_channel), jnp.float32),
        "ln2_b": jnp.zeros((1, out_channel), jnp.float32),
    }
    return p


def reference(x_nchw, p):
    """Pure-JAX reference matching the PyTorch forward exactly."""
    x = jnp.transpose(x_nchw, (0, 2, 3, 1)).astype(jnp.float32)  # NHWC
    dn = ("NHWC", "HWIO", "NHWC")

    def conv(z, w, b, pad):
        return lax.conv_general_dilated(
            z, w, (1, 1), [(pad, pad), (pad, pad)],
            dimension_numbers=dn) + b.reshape(1, 1, 1, -1)

    x2 = conv(x, p["w3_4d"], p["b3"], 1)
    x2 = _layernorm_nhwc(x2, p["ln1_w"].reshape(-1), p["ln1_b"].reshape(-1))
    y = conv(x, p["w1_4d"], p["b1"], 2)
    y = _layernorm_nhwc(y, p["ln2_w"].reshape(-1), p["ln2_b"].reshape(-1))
    a = p["prelu_alpha"].reshape(1, 1, 1, -1)
    y = jnp.where(y > 0, y, a * y)
    y = conv(y, p["w2_4d"], p["b2"], 1)
    out = x2 * y + p["dbias"].reshape(1, 1, 1, -1)
    # PyTorch nn.PixelUnshuffle(2) on NCHW
    out = jnp.transpose(out, (0, 3, 1, 2))
    n, c, h, w = out.shape
    out = out.reshape(n, c, h // 2, 2, w // 2, 2)
    out = jnp.transpose(out, (0, 1, 3, 5, 2, 4))
    return out.reshape(n, c * 4, h // 2, w // 2)


if __name__ == "__main__":
    key = jax.random.PRNGKey(0)
    kx, kp = jax.random.split(key)

    N, C_in, H, W = 2, 4, 16, 16   # small demo shapes
    C_out = 16                     # out_channel (C_out // 4 = 4)

    x = jax.random.normal(kx, (N, C_in, H, W), jnp.float32)
    params = init_params(kp, C_in, C_out)

    fwd = jax.jit(lambda xx: depth_transform_encoder(xx, params))
    out = jax.block_until_ready(fwd(x))

    ref = reference(x, params)
    assert out.shape == (N, (C_out // 4) * 4, H // 2, W // 2), out.shape
    # MXU matmul accumulation order differs from XLA's conv, so allow 1e-3.
    if not jnp.allclose(out, ref, atol=1e-3, rtol=1e-3):
        raise AssertionError(
            f"kernel/reference mismatch, max abs err = {jnp.max(jnp.abs(out - ref))}")
    print("KERNEL_OK")
</pallas_src>

<mosaic_0001>
module attributes {stable_mosaic.version = 11 : i64} {
  func.func @kernel(%arg0: i32, %arg1: memref<1x4x512xf32, #tpu.memory_space<vmem>>, %arg2: memref<20x100xf32, #tpu.memory_space<vmem>>, %arg3: memref<4x144xf32, #tpu.memory_space<vmem>>, %arg4: memref<1x384xf32, #tpu.memory_space<vmem>>, %arg5: memref<16x1xf32, #tpu.memory_space<vmem>>, %arg6: memref<4x1xf32, #tpu.memory_space<vmem>>, %arg7: memref<4x1xf32, #tpu.memory_space<vmem>>, %arg8: memref<16x1xf32, #tpu.memory_space<vmem>>, %arg9: memref<4x1xf32, #tpu.memory_space<vmem>>, %arg10: memref<4x1xf32, #tpu.memory_space<vmem>>, %arg11: memref<16x1xf32, #tpu.memory_space<vmem>>, %arg12: memref<16x1xf32, #tpu.memory_space<vmem>>, %arg13: memref<4x1xf32, #tpu.memory_space<vmem>>, %arg14: memref<1x4x384xf32, #tpu.memory_space<vmem>>, %arg15: memref<100x384xf32, #tpu.memory_space<vmem>>, %arg16: memref<144x384xf32, #tpu.memory_space<vmem>>, %arg17: memref<16x640xf32, #tpu.memory_space<vmem>>) attributes {dimension_semantics = [#tpu.dimension_semantics<parallel>], iteration_bounds = array<i64: 2>, scalar_prefetch = 0 : i64, scratch_operands = 3 : i64, tpu.core_type = #tpu.core_type<tc>, window_params = [{transform_indices = @transform_0, window_bounds = array<i64: 1, 4, 512>}, {pipeline_mode = #tpu.pipeline_mode<synchronous>, transform_indices = @transform_1, window_bounds = array<i64: 20, 100>}, {pipeline_mode = #tpu.pipeline_mode<synchronous>, transform_indices = @transform_2, window_bounds = array<i64: 4, 144>}, {pipeline_mode = #tpu.pipeline_mode<synchronous>, transform_indices = @transform_3, window_bounds = array<i64: 1, 384>}, {pipeline_mode = #tpu.pipeline_mode<synchronous>, transform_indices = @transform_4, window_bounds = array<i64: 16, 1>}, {pipeline_mode = #tpu.pipeline_mode<synchronous>, transform_indices = @transform_5, window_bounds = array<i64: 4, 1>}, {pipeline_mode = #tpu.pipeline_mode<synchronous>, transform_indices = @transform_6, window_bounds = array<i64: 4, 1>}, {pipeline_mode = #tpu.pipeline_mode<synchronous>, transform_indices = @transform_7, window_bounds = array<i64: 16, 1>}, {pipeline_mode = #tpu.pipeline_mode<synchronous>, transform_indices = @transform_8, window_bounds = array<i64: 4, 1>}, {pipeline_mode = #tpu.pipeline_mode<synchronous>, transform_indices = @transform_9, window_bounds = array<i64: 4, 1>}, {pipeline_mode = #tpu.pipeline_mode<synchronous>, transform_indices = @transform_10, window_bounds = array<i64: 16, 1>}, {pipeline_mode = #tpu.pipeline_mode<synchronous>, transform_indices = @transform_11, window_bounds = array<i64: 16, 1>}, {pipeline_mode = #tpu.pipeline_mode<synchronous>, transform_indices = @transform_12, window_bounds = array<i64: 4, 1>}, {transform_indices = @transform_13, window_bounds = array<i64: 1, 4, 384>}]} {
    %c0 = arith.constant 0 : index
    %c0_0 = arith.constant 0 : index
    %c0_1 = arith.constant 0 : index
    %0 = vector.load %arg1[%c0, %c0_0, %c0_1] : memref<1x4x512xf32, #tpu.memory_space<vmem>>, vector<1x4x384xf32>
    %1 = vector.shape_cast %0 : vector<1x4x384xf32> to vector<4x384xf32>
    %c0_2 = arith.constant 0 : index
    %c0_3 = arith.constant 0 : index
    %2 = vector.load %arg15[%c0_2, %c0_3] : memref<100x384xf32, #tpu.memory_space<vmem>>, vector<4x384xf32>
    tpu.vector_store %arg15[%c0_2, %c0_3], %1 {strides = array<i32>} : memref<100x384xf32, #tpu.memory_space<vmem>>, vector<4x384xf32>,
    %c0_4 = arith.constant 0 : index
    %c0_5 = arith.constant 0 : index
    %c1 = arith.constant 1 : index
    %3 = vector.load %arg1[%c0_4, %c0_5, %c1] : memref<1x4x512xf32, #tpu.memory_space<vmem>>, vector<1x4x384xf32>
    %4 = vector.shape_cast %3 : vector<1x4x384xf32> to vector<4x384xf32>
    %c4 = arith.constant 4 : index
    %c0_6 = arith.constant 0 : index
    %5 = vector.load %arg15[%c4, %c0_6] : memref<100x384xf32, #tpu.memory_space<vmem>>, vector<4x384xf32>
    tpu.vector_store %arg15[%c4, %c0_6], %4 {strides = array<i32>} : memref<100x384xf32, #tpu.memory_space<vmem>>, vector<4x384xf32>,
    %c0_7 = arith.constant 0 : index
    %c0_8 = arith.constant 0 : index
    %c2 = arith.constant 2 : index
    %6 = vector.load %arg1[%c0_7, %c0_8, %c2] : memref<1x4x512xf32, #tpu.memory_space<vmem>>, vector<1x4x384xf32>
    %7 = vector.shape_cast %6 : vector<1x4x384xf32> to vector<4x384xf32>
    %c8 = arith.constant 8 : index
    %c0_9 = arith.constant 0 : index
    %8 = vector.load %arg15[%c8, %c0_9] : memref<100x384xf32, #tpu.memory_space<vmem>>, vector<4x384xf32>
    tpu.vector_store %arg15[%c8, %c0_9], %7 {strides = array<i32>} : memref<100x384xf32, #tpu.memory_space<vmem>>, vector<4x384xf32>,
    %c0_10 = arith.constant 0 : index
    %c0_11 = arith.constant 0 : index
    %c3 = arith.constant 3 : index
    %9 = vector.load %arg1[%c0_10, %c0_11, %c3] : memref<1x4x512xf32, #tpu.memory_space<vmem>>, vector<1x4x384xf32>
    %10 = vector.shape_cast %9 : vector<1x4x384xf32> to vector<4x384xf32>
    %c12 = arith.constant 12 : index
    %c0_12 = arith.constant 0 : index
    %11 = vector.load %arg15[%c12, %c0_12] : memref<100x384xf32, #tpu.memory_space<vmem>>, vector<4x384xf32>
    tpu.vector_store %arg15[%c12, %c0_12], %10 {strides = array<i32>} : memref<100x384xf32, #tpu.memory_space<vmem>>, vector<4x384xf32>,
    %c0_13 = arith.constant 0 : index
    %c0_14 = arith.constant 0 : index
    %c4_15 = arith.constant 4 : index
    %12 = vector.load %arg1[%c0_13, %c0_14, %c4_15] : memref<1x4x512xf32, #tpu.memory_space<vmem>>, vector<1x4x384xf32>
    %13 = vector.shape_cast %12 : vector<1x4x384xf32> to vector<4x384xf32>
    %c16 = arith.constant 16 : index
    %c0_16 = arith.constant 0 : index
    %14 = vector.load %arg15[%c16, %c0_16] : memref<100x384xf32, #tpu.memory_space<vmem>>, vector<4x384xf32>
    tpu.vector_store %arg15[%c16, %c0_16], %13 {strides = array<i32>} : memref<100x384xf32, #tpu.memory_space<vmem>>, vector<4x384xf32>,
    %c0_17 = arith.constant 0 : index
    %c0_18 = arith.constant 0 : index
    %c24 = arith.constant 24 : index
    %15 = vector.load %arg1[%c0_17, %c0_18, %c24] : memref<1x4x512xf32, #tpu.memory_space<vmem>>, vector<1x4x384xf32>
    %16 = vector.shape_cast %15 : vector<1x4x384xf32> to vector<4x384xf32>
    %c20 = arith.constant 20 : index
    %c0_19 = arith.constant 0 : index
    %17 = vector.load %arg15[%c20, %c0_19] : memref<100x384xf32, #tpu.memory_space<vmem>>, vector<4x384xf32>
    tpu.vector_store %arg15[%c20, %c0_19], %16 {strides = array<i32>} : memref<100x384xf32, #tpu.memory_space<vmem>>, vector<4x384xf32>,
    %c0_20 = arith.constant 0 : index
    %c0_21 = arith.constant 0 : index
    %c25 = arith.constant 25 : index
    %18 = vector.load %arg1[%c0_20, %c0_21, %c25] : memref<1x4x512xf32, #tpu.memory_space<vmem>>, vector<1x4x384xf32>
    %19 = vector.shape_cast %18 : vector<1x4x384xf32> to vector<4x384xf32>
    %c24_22 = arith.constant 24 : index
    %c0_23 = arith.constant 0 : index
    %20 = vector.load %arg15[%c24_22, %c0_23] : memref<100x384xf32, #tpu.memory_space<vmem>>, vector<4x384xf32>
    tpu.vector_store %arg15[%c24_22, %c0_23], %19 {strides = array<i32>} : memref<100x384xf32, #tpu.memory_space<vmem>>, vector<4x384xf32>,
    %c0_24 = arith.constant 0 : index
    %c0_25 = arith.constant 0 : index
    %c26 = arith.constant 26 : index
    %21 = vector.load %arg1[%c0_24, %c0_25, %c26] : memref<1x4x512xf32, #tpu.memory_space<vmem>>, vector<1x4x384xf32>
    %22 = vector.shape_cast %21 : vector<1x4x384xf32> to vector<4x384xf32>
    %c28 = arith.constant 28 : index
    %c0_26 = arith.constant 0 : index
    %23 = vector.load %arg15[%c28, %c0_26] : memref<100x384xf32, #tpu.memory_space<vmem>>, vector<4x384xf32>
    tpu.vector_store %arg15[%c28, %c0_26], %22 {strides = array<i32>} : memref<100x384xf32, #tpu.memory_space<vmem>>, vector<4x384xf32>,
    %c0_27 = arith.constant 0 : index
    %c0_28 = arith.constant 0 : index
    %c27 = arith.constant 27 : index
    %24 = vector.load %arg1[%c0_27, %c0_28, %c27] : memref<1x4x512xf32, #tpu.memory_space<vmem>>, vector<1x4x384xf32>
    %25 = vector.shape_cast %24 : vector<1x4x384xf32> to vector<4x384xf32>
    %c32 = arith.constant 32 : index
    %c0_29 = arith.constant 0 : index
    %26 = vector.load %arg15[%c32, %c0_29] : memref<100x384xf32, #tpu.memory_space<vmem>>, vector<4x384xf32>
    tpu.vector_store %arg15[%c32, %c0_29], %25 {strides = array<i32>} : memref<100x384xf32, #tpu.memory_space<vmem>>, vector<4x384xf32>,
    %c0_30 = arith.constant 0 : index
    %c0_31 = arith.constant 0 : index
    %c28_32 = arith.constant 28 : index
    %27 = vector.load %arg1[%c0_30, %c0_31, %c28_32] : memref<1x4x512xf32, #tpu.memory_space<vmem>>, vector<1x4x384xf32>
    %28 = vector.shape_cast %27 : vector<1x4x384xf32> to vector<4x384xf32>
    %c36 = arith.constant 36 : index
    %c0_33 = arith.constant 0 : index
    %29 = vector.load %arg15[%c36, %c0_33] : memref<100x384xf32, #tpu.memory_space<vmem>>, vector<4x384xf32>
    tpu.vector_store %arg15[%c36, %c0_33], %28 {strides = array<i32>} : memref<100x384xf32, #tpu.memory_space<vmem>>, vector<4x384xf32>,
    %c0_34 = arith.constant 0 : index
    %c0_35 = arith.constant 0 : index
    %c48 = arith.constant 48 : index
    %30 = vector.load %arg1[%c0_34, %c0_35, %c48] : memref<1x4x512xf32, #tpu.memory_space<vmem>>, vector<1x4x384xf32>
    %31 = vector.shape_cast %30 : vector<1x4x384xf32> to vector<4x384xf32>
    %c40 = arith.constant 40 : index
    %c0_36 = arith.constant 0 : index
    %32 = vector.load %arg15[%c40, %c0_36] : memref<100x384xf32, #tpu.memory_space<vmem>>, vector<4x384xf32>
    tpu.vector_store %arg15[%c40, %c0_36], %31 {strides = array<i32>} : memref<100x384xf32, #tpu.memory_space<vmem>>, vector<4x384xf32>,
    %c0_37 = arith.constant 0 : index
    %c0_38 = arith.constant 0 : index
    %c49 = arith.constant 49 : index
    %33 = vector.load %arg1[%c0_37, %c0_38, %c49] : memref<1x4x512xf32, #tpu.memory_space<vmem>>, vector<1x4x384xf32>
    %34 = vector.shape_cast %33 : vector<1x4x384xf32> to vector<4x384xf32>
    %c44 = arith.constant 44 : index
    %c0_39 = arith.constant 0 : index
    %35 = vector.load %arg15[%c44, %c0_39] : memref<100x384xf32, #tpu.memory_space<vmem>>, vector<4x384xf32>
    tpu.vector_store %arg15[%c44, %c0_39], %34 {strides = array<i32>} : memref<100x384xf32, #tpu.memory_space<vmem>>, vector<4x384xf32>,
    %c0_40 = arith.constant 0 : index
    %c0_41 = arith.constant 0 : index
    %c50 = arith.constant 50 : index
    %36 = vector.load %arg1[%c0_40, %c0_41, %c50] : memref<1x4x512xf32, #tpu.memory_space<vmem>>, vector<1x4x384xf32>
    %37 = vector.shape_cast %36 : vector<1x4x384xf32> to vector<4x384xf32>
    %c48_42 = arith.constant 48 : index
    %c0_43 = arith.constant 0 : index
    %38 = vector.load %arg15[%c48_42, %c0_43] : memref<100x384xf32, #tpu.memory_space<vmem>>, vector<4x384xf32>
    tpu.vector_store %arg15[%c48_42, %c0_43], %37 {strides = array<i32>} : memref<100x384xf32, #tpu.memory_space<vmem>>, vector<4x384xf32>,
    %c0_44 = arith.constant 0 : index
    %c0_45 = arith.constant 0 : index
    %c51 = arith.constant 51 : index
    %39 = vector.load %arg1[%c0_44, %c0_45, %c51] : memref<1x4x512xf32, #tpu.memory_space<vmem>>, vector<1x4x384xf32>
    %40 = vector.shape_cast %39 : vector<1x4x384xf32> to vector<4x384xf32>
    %c52 = arith.constant 52 : index
    %c0_46 = arith.constant 0 : index
    %41 = vector.load %arg15[%c52, %c0_46] : memref<100x384xf32, #tpu.memory_space<vmem>>, vector<4x384xf32>
    tpu.vector_store %arg15[%c52, %c0_46], %40 {strides = array<i32>} : memref<100x384xf32, #tpu.memory_space<vmem>>, vector<4x384xf32>,
    %c0_47 = arith.constant 0 : index
    %c0_48 = arith.constant 0 : index
    %c52_49 = arith.constant 52 : index
    %42 = vector.load %arg1[%c0_47, %c0_48, %c52_49] : memref<1x4x512xf32, #tpu.memory_space<vmem>>, vector<1x4x384xf32>
    %43 = vector.shape_cast %42 : vector<1x4x384xf32> to vector<4x384xf32>
    %c56 = arith.constant 56 : index
    %c0_50 = arith.constant 0 : index
    %44 = vector.load %arg15[%c56, %c0_50] : memref<100x384xf32, #tpu.memory_space<vmem>>, vector<4x384xf32>
    tpu.vector_store %arg15[%c56, %c0_50], %43 {strides = array<i32>} : memref<100x384xf32, #tpu.memory_space<vmem>>, vector<4x384xf32>,
    %c0_51 = arith.constant 0 : index
    %c0_52 = arith.constant 0 : index
    %c72 = arith.constant 72 : index
    %45 = vector.load %arg1[%c0_51, %c0_52, %c72] : memref<1x4x512xf32, #tpu.memory_space<vmem>>, vector<1x4x384xf32>
    %46 = vector.shape_cast %45 : vector<1x4x384xf32> to vector<4x384xf32>
    %c60 = arith.constant 60 : index
    %c0_53 = arith.constant 0 : index
    %47 = vector.load %arg15[%c60, %c0_53] : memref<100x384xf32, #tpu.memory_space<vmem>>, vector<4x384xf32>
    tpu.vector_store %arg15[%c60, %c0_53], %46 {strides = array<i32>} : memref<100x384xf32, #tpu.memory_space<vmem>>, vector<4x384xf32>,
    %c0_54 = arith.constant 0 : index
    %c0_55 = arith.constant 0 : index
    %c73 = arith.constant 73 : index
    %48 = vector.load %arg1[%c0_54, %c0_55, %c73] : memref<1x4x512xf32, #tpu.memory_space<vmem>>, vector<1x4x384xf32>
    %49 = vector.shape_cast %48 : vector<1x4x384xf32> to vector<4x384xf32>
    %c64 = arith.constant 64 : index
    %c0_56 = arith.constant 0 : index
    %50 = vector.load %arg15[%c64, %c0_56] : memref<100x384xf32, #tpu.memory_space<vmem>>, vector<4x384xf32>
    tpu.vector_store %arg15[%c64, %c0_56], %49 {strides = array<i32>} : memref<100x384xf32, #tpu.memory_space<vmem>>, vector<4x384xf32>,
    %c0_57 = arith.constant 0 : index
    %c0_58 = arith.constant 0 : index
    %c74 = arith.constant 74 : index
    %51 = vector.load %arg1[%c0_57, %c0_58, %c74] : memref<1x4x512xf32, #tpu.memory_space<vmem>>, vector<1x4x384xf32>
    %52 = vector.shape_cast %51 : vector<1x4x384xf32> to vector<4x384xf32>
    %c68 = arith.constant 68 : index
    %c0_59 = arith.constant 0 : index
    %53 = vector.load %arg15[%c68, %c0_59] : memref<100x384xf32, #tpu.memory_space<vmem>>, vector<4x384xf32>
    tpu.vector_store %arg15[%c68, %c0_59], %52 {strides = array<i32>} : memref<100x384xf32, #tpu.memory_space<vmem>>, vector<4x384xf32>,
    %c0_60 = arith.constant 0 : index
    %c0_61 = arith.constant 0 : index
    %c75 = arith.constant 75 : index
    %54 = vector.load %arg1[%c0_60, %c0_61, %c75] : memref<1x4x512xf32, #tpu.memory_space<vmem>>, vector<1x4x384xf32>
    %55 = vector.shape_cast %54 : vector<1x4x384xf32> to vector<4x384xf32>
    %c72_62 = arith.constant 72 : index
    %c0_63 = arith.constant 0 : index
    %56 = vector.load %arg15[%c72_62, %c0_63] : memref<100x384xf32, #tpu.memory_space<vmem>>, vector<4x384xf32>
    tpu.vector_store %arg15[%c72_62, %c0_63], %55 {strides = array<i32>} : memref<100x384xf32, #tpu.memory_space<vmem>>, vector<4x384xf32>,
    %c0_64 = arith.constant 0 : index
    %c0_65 = arith.constant 0 : index
    %c76 = arith.constant 76 : index
    %57 = vector.load %arg1[%c0_64, %c0_65, %c76] : memref<1x4x512xf32, #tpu.memory_space<vmem>>, vector<1x4x384xf32>
    %58 = vector.shape_cast %57 : vector<1x4x384xf32> to vector<4x384xf32>
    %c76_66 = arith.constant 76 : index
    %c0_67 = arith.constant 0 : index
    %59 = vector.load %arg15[%c76_66, %c0_67] : memref<100x384xf32, #tpu.memory_space<vmem>>, vector<4x384xf32>
    tpu.vector_store %arg15[%c76_66, %c0_67], %58 {strides = array<i32>} : memref<100x384xf32, #tpu.memory_space<vmem>>, vector<4x384xf32>,
    %c0_68 = arith.constant 0 : index
    %c0_69 = arith.constant 0 : index
    %c96 = arith.constant 96 : index
    %60 = vector.load %arg1[%c0_68, %c0_69, %c96] : memref<1x4x512xf32, #tpu.memory_space<vmem>>, vector<1x4x384xf32>
    %61 = vector.shape_cast %60 : vector<1x4x384xf32> to vector<4x384xf32>
    %c80 = arith.constant 80 : index
    %c0_70 = arith.constant 0 : index
    %62 = vector.load %arg15[%c80, %c0_70] : memref<100x384xf32, #tpu.memory_space<vmem>>, vector<4x384xf32>
    tpu.vector_store %arg15[%c80, %c0_70], %61 {strides = array<i32>} : memref<100x384xf32, #tpu.memory_space<vmem>>, vector<4x384xf32>,
    %c0_71 = arith.constant 0 : index
    %c0_72 = arith.constant 0 : index
    %c97 = arith.constant 97 : index
    %63 = vector.load %arg1[%c0_71, %c0_72, %c97] : memref<1x4x512xf32, #tpu.memory_space<vmem>>, vector<1x4x384xf32>
    %64 = vector.shape_cast %63 : vector<1x4x384xf32> to vector<4x384xf32>
    %c84 = arith.constant 84 : index
    %c0_73 = arith.constant 0 : index
    %65 = vector.load %arg15[%c84, %c0_73] : memref<100x384xf32, #tpu.memory_space<vmem>>, vector<4x384xf32>
    tpu.vector_store %arg15[%c84, %c0_73], %64 {strides = array<i32>} : memref<100x384xf32, #tpu.memory_space<vmem>>, vector<4x384xf32>,
    %c0_74 = arith.constant 0 : index
    %c0_75 = arith.constant 0 : index
    %c98 = arith.constant 98 : index
    %66 = vector.load %arg1[%c0_74, %c0_75, %c98] : memref<1x4x512xf32, #tpu.memory_space<vmem>>, vector<1x4x384xf32>
    %67 = vector.shape_cast %66 : vector<1x4x384xf32> to vector<4x384xf32>
    %c88 = arith.constant 88 : index
    %c0_76 = arith.constant 0 : index
    %68 = vector.load %arg15[%c88, %c0_76] : memref<100x384xf32, #tpu.memory_space<vmem>>, vector<4x384xf32>
    tpu.vector_store %arg15[%c88, %c0_76], %67 {strides = array<i32>} : memref<100x384xf32, #tpu.memory_space<vmem>>, vector<4x384xf32>,
    %c0_77 = arith.constant 0 : index
    %c0_78 = arith.constant 0 : index
    %c99 = arith.constant 99 : index
    %69 = vector.load %arg1[%c0_77, %c0_78, %c99] : memref<1x4x512xf32, #tpu.memory_space<vmem>>, vector<1x4x384xf32>
    %70 = vector.shape_cast %69 : vector<1x4x384xf32> to vector<4x384xf32>
    %c92 = arith.constant 92 : index
    %c0_79 = arith.constant 0 : index
    %71 = vector.load %arg15[%c92, %c0_79] : memref<100x384xf32, #tpu.memory_space<vmem>>, vector<4x384xf32>
    tpu.vector_store %arg15[%c92, %c0_79], %70 {strides = array<i32>} : memref<100x384xf32, #tpu.memory_space<vmem>>, vector<4x384xf32>,
    %c0_80 = arith.constant 0 : index
    %c0_81 = arith.constant 0 : index
    %c100 = arith.constant 100 : index
    %72 = vector.load %arg1[%c0_80, %c0_81, %c100] : memref<1x4x512xf32, #tpu.memory_space<vmem>>, vector<1x4x384xf32>
    %73 = vector.shape_cast %72 : vector<1x4x384xf32> to vector<4x384xf32>
    %c96_82 = arith.constant 96 : index
    %c0_83 = arith.constant 0 : index
    %74 = vector.load %arg15[%c96_82, %c0_83] : memref<100x384xf32, #tpu.memory_space<vmem>>, vector<4x384xf32>
    tpu.vector_store %arg15[%c96_82, %c0_83], %73 {strides = array<i32>} : memref<100x384xf32, #tpu.memory_space<vmem>>, vector<4x384xf32>,
    %c0_84 = arith.constant 0 : index
    %c0_85 = arith.constant 0 : index
    %75 = vector.load %arg2[%c0_84, %c0_85] : memref<20x100xf32, #tpu.memory_space<vmem>>, vector<20x100xf32>
    %c0_86 = arith.constant 0 : index
    %c0_87 = arith.constant 0 : index
    %76 = vector.load %arg15[%c0_86, %c0_87] : memref<100x384xf32, #tpu.memory_space<vmem>>, vector<100x384xf32>
    %cst = arith.constant dense<0.000000e+00> : vector<20x384xf32>
    %77 = tpu.matmul %75, %76, %cst {dimension_numbers = #tpu.dot_dimension_numbers<[1], [0], [0], [1], [0, 0, 1, 1], [], []>} : vector<20x100xf32>, vector<100x384xf32>, vector<20x384xf32> -> vector<20x384xf32>
    %78 = vector.extract_strided_slice %77 {offsets = [0, 0], sizes = [16, 384], strides = [1, 1]} : vector<20x384xf32> to vector<16x384xf32>
    %c0_88 = arith.constant 0 : index
    %c0_89 = arith.constant 0 : index
    %79 = vector.load %arg5[%c0_88, %c0_89] : memref<16x1xf32, #tpu.memory_space<vmem>>, vector<16x1xf32>
    %80 = vector.broadcast %79 : vector<16x1xf32> to vector<16x384xf32>
    %81 = arith.addf %78, %80 : vector<16x384xf32>
    %82 = vector.extract_strided_slice %77 {offsets = [16, 0], sizes = [4, 384], strides = [1, 1]} : vector<20x384xf32> to vector<4x384xf32>
    %c0_90 = arith.constant 0 : index
    %c0_91 = arith.constant 0 : index
    %83 = vector.load %arg7[%c0_90, %c0_91] : memref<4x1xf32, #tpu.memory_space<vmem>>, vector<4x1xf32>
    %84 = vector.broadcast %83 : vector<4x1xf32> to vector<4x384xf32>
    %85 = arith.addf %82, %84 : vector<4x384xf32>
    %c0_92 = arith.constant 0 : index
    %c0_93 = arith.constant 0 : index
    %86 = vector.load %arg9[%c0_92, %c0_93] : memref<4x1xf32, #tpu.memory_space<vmem>>, vector<4x1xf32>
    %c0_94 = arith.constant 0 : index
    %c0_95 = arith.constant 0 : index
    %87 = vector.load %arg10[%c0_94, %c0_95] : memref<4x1xf32, #tpu.memory_space<vmem>>, vector<4x1xf32>
    %cst_96 = arith.constant dense<0.000000e+00> : vector<384xf32>
    %88 = vector.multi_reduction <add>, %85, %cst_96 [0] : vector<4x384xf32> to vector<384xf32>
    %89 = vector.shape_cast %88 : vector<384xf32> to vector<1x384xf32>
    %cst_97 = arith.constant 4.000000e+00 : f32
    %90 = vector.broadcast %cst_97 : f32 to vector<1x384xf32>
    %91 = arith.divf %89, %90 : vector<1x384xf32>
    %92 = vector.broadcast %91 : vector<1x384xf32> to vector<4x384xf32>
    %93 = arith.subf %85, %92 : vector<4x384xf32>
    %94 = arith.mulf %93, %93 : vector<4x384xf32>
    %cst_98 = arith.constant dense<0.000000e+00> : vector<384xf32>
    %95 = vector.multi_reduction <add>, %94, %cst_98 [0] : vector<4x384xf32> to vector<384xf32>
    %96 = vector.shape_cast %95 : vector<384xf32> to vector<1x384xf32>
    %cst_99 = arith.constant 4.000000e+00 : f32
    %97 = vector.broadcast %cst_99 : f32 to vector<1x384xf32>
    %98 = arith.divf %96, %97 : vector<1x384xf32>
    %99 = vector.broadcast %91 : vector<1x384xf32> to vector<4x384xf32>
    %100 = arith.subf %85, %99 : vector<4x384xf32>
    %cst_100 = arith.constant 9.99999974E-6 : f32
    %101 = vector.broadcast %cst_100 : f32 to vector<1x384xf32>
    %102 = arith.addf %98, %101 : vector<1x384xf32>
    %103 = math.rsqrt %102 : vector<1x384xf32>
    %104 = vector.broadcast %103 : vector<1x384xf32> to vector<4x384xf32>
    %105 = arith.mulf %100, %104 : vector<4x384xf32>
    %106 = vector.broadcast %86 : vector<4x1xf32> to vector<4x384xf32>
    %107 = arith.mulf %105, %106 : vector<4x384xf32>
    %108 = vector.broadcast %87 : vector<4x1xf32> to vector<4x384xf32>
    %109 = arith.addf %107, %108 : vector<4x384xf32>
    %c0_101 = arith.constant 0 : index
    %c0_102 = arith.constant 0 : index
    %110 = vector.load %arg11[%c0_101, %c0_102] : memref<16x1xf32, #tpu.memory_space<vmem>>, vector<16x1xf32>
    %c0_103 = arith.constant 0 : index
    %c0_104 = arith.constant 0 : index
    %111 = vector.load %arg12[%c0_103, %c0_104] : memref<16x1xf32, #tpu.memory_space<vmem>>, vector<16x1xf32>
    %cst_105 = arith.constant dense<0.000000e+00> : vector<384xf32>
    %112 = vector.multi_reduction <add>, %81, %cst_105 [0] : vector<16x384xf32> to vector<384xf32>
    %113 = vector.shape_cast %112 : vector<384xf32> to vector<1x384xf32>
    %cst_106 = arith.constant 1.600000e+01 : f32
    %114 = vector.broadcast %cst_106 : f32 to vector<1x384xf32>
    %115 = arith.divf %113, %114 : vector<1x384xf32>
    %116 = vector.broadcast %115 : vector<1x384xf32> to vector<16x384xf32>
    %117 = arith.subf %81, %116 : vector<16x384xf32>
    %118 = arith.mulf %117, %117 : vector<16x384xf32>
    %cst_107 = arith.constant dense<0.000000e+00> : vector<384xf32>
    %119 = vector.multi_reduction <add>, %118, %cst_107 [0] : vector<16x384xf32> to vector<384xf32>
    %120 = vector.shape_cast %119 : vector<384xf32> to vector<1x384xf32>
    %cst_108 = arith.constant 1.600000e+01 : f32
    %121 = vector.broadcast %cst_108 : f32 to vector<1x384xf32>
    %122 = arith.divf %120, %121 : vector<1x384xf32>
    %123 = vector.broadcast %115 : vector<1x384xf32> to vector<16x384xf32>
    %124 = arith.subf %81, %123 : vector<16x384xf32>
    %cst_109 = arith.constant 9.99999974E-6 : f32
    %125 = vector.broadcast %cst_109 : f32 to vector<1x384xf32>
    %126 = arith.addf %122, %125 : vector<1x384xf32>
    %127 = math.rsqrt %126 : vector<1x384xf32>
    %128 = vector.broadcast %127 : vector<1x384xf32> to vector<16x384xf32>
    %129 = arith.mulf %124, %128 : vector<16x384xf32>
    %130 = vector.broadcast %110 : vector<16x1xf32> to vector<16x384xf32>
    %131 = arith.mulf %129, %130 : vector<16x384xf32>
    %132 = vector.broadcast %111 : vector<16x1xf32> to vector<16x384xf32>
    %133 = arith.addf %131, %132 : vector<16x384xf32>
    %c0_110 = arith.constant 0 : index
    %c0_111 = arith.constant 0 : index
    %134 = vector.load %arg8[%c0_110, %c0_111] : memref<16x1xf32, #tpu.memory_space<vmem>>, vector<16x1xf32>
    %cst_112 = arith.constant 0.000000e+00 : f32
    %135 = vector.broadcast %cst_112 : f32 to vector<16x384xf32>
    %136 = arith.cmpf ogt, %133, %135 : vector<16x384xf32>
    %137 = vector.broadcast %134 : vector<16x1xf32> to vector<16x384xf32>
    %138 = arith.mulf %137, %133 : vector<16x384xf32>
    %139 = arith.select %136, %133, %138 : vector<16x384xi1>, vector<16x384xf32>
    %c0_113 = arith.constant 0 : index
    %c0_114 = arith.constant 0 : index
    %140 = vector.load %arg4[%c0_113, %c0_114] : memref<1x384xf32, #tpu.memory_space<vmem>>, vector<1x384xf32>
    %141 = vector.broadcast %140 : vector<1x384xf32> to vector<16x384xf32>
    %142 = arith.mulf %139, %141 : vector<16x384xf32>
    %cst_115 = arith.constant 0.000000e+00 : f32
    %143 = vector.broadcast %cst_115 : f32 to vector<16x128xf32>
    %c0_116 = arith.constant 0 : index
    %c0_117 = arith.constant 0 : index
    %144 = vector.load %arg17[%c0_116, %c0_117] : memref<16x640xf32, #tpu.memory_space<vmem>>, vector<16x128xf32>
    tpu.vector_store %arg17[%c0_116, %c0_117], %143 {strides = array<i32>} : memref<16x640xf32, #tpu.memory_space<vmem>>, vector<16x128xf32>,
    %c0_118 = arith.constant 0 : index
    %c128 = arith.constant 128 : index
    %145 = vector.load %arg17[%c0_118, %c128] : memref<16x640xf32, #tpu.memory_space<vmem>>, vector<16x384xf32>
    tpu.vector_store %arg17[%c0_118, %c128], %142 {strides = array<i32>} : memref<16x640xf32, #tpu.memory_space<vmem>>, vector<16x384xf32>,
    %cst_119 = arith.constant 0.000000e+00 : f32
    %146 = vector.broadcast %cst_119 : f32 to vector<16x128xf32>
    %c0_120 = arith.constant 0 : index
    %c512 = arith.constant 512 : index
    %147 = vector.load %arg17[%c0_120, %c512] : memref<16x640xf32, #tpu.memory_space<vmem>>, vector<16x128xf32>
    tpu.vector_store %arg17[%c0_120, %c512], %146 {strides = array<i32>} : memref<16x640xf32, #tpu.memory_space<vmem>>, vector<16x128xf32>,
    %c0_121 = arith.constant 0 : index
    %c103 = arith.constant 103 : index
    %148 = vector.load %arg17[%c0_121, %c103] : memref<16x640xf32, #tpu.memory_space<vmem>>, vector<16x384xf32>
    %c0_122 = arith.constant 0 : index
    %c0_123 = arith.constant 0 : index
    %149 = vector.load %arg16[%c0_122, %c0_123] : memref<144x384xf32, #tpu.memory_space<vmem>>, vector<16x384xf32>
    tpu.vector_store %arg16[%c0_122, %c0_123], %148 {strides = array<i32>} : memref<144x384xf32, #tpu.memory_space<vmem>>, vector<16x384xf32>,
    %c0_124 = arith.constant 0 : index
    %c104 = arith.constant 104 : index
    %150 = vector.load %arg17[%c0_124, %c104] : memref<16x640xf32, #tpu.memory_space<vmem>>, vector<16x384xf32>
    %c16_125 = arith.constant 16 : index
    %c0_126 = arith.constant 0 : index
    %151 = vector.load %arg16[%c16_125, %c0_126] : memref<144x384xf32, #tpu.memory_space<vmem>>, vector<16x384xf32>
    tpu.vector_store %arg16[%c16_125, %c0_126], %150 {strides = array<i32>} : memref<144x384xf32, #tpu.memory_space<vmem>>, vector<16x384xf32>,
    %c0_127 = arith.constant 0 : index
    %c105 = arith.constant 105 : index
    %152 = vector.load %arg17[%c0_127, %c105] : memref<16x640xf32, #tpu.memory_space<vmem>>, vector<16x384xf32>
    %c32_128 = arith.constant 32 : index
    %c0_129 = arith.constant 0 : index
    %153 = vector.load %arg16[%c32_128, %c0_129] : memref<144x384xf32, #tpu.memory_space<vmem>>, vector<16x384xf32>
    tpu.vector_store %arg16[%c32_128, %c0_129], %152 {strides = array<i32>} : memref<144x384xf32, #tpu.memory_space<vmem>>, vector<16x384xf32>,
    %c0_130 = arith.constant 0 : index
    %c127 = arith.constant 127 : index
    %154 = vector.load %arg17[%c0_130, %c127] : memref<16x640xf32, #tpu.memory_space<vmem>>, vector<16x384xf32>
    %c48_131 = arith.constant 48 : index
    %c0_132 = arith.constant 0 : index
    %155 = vector.load %arg16[%c48_131, %c0_132] : memref<144x384xf32, #tpu.memory_space<vmem>>, vector<16x384xf32>
    tpu.vector_store %arg16[%c48_131, %c0_132], %154 {strides = array<i32>} : memref<144x384xf32, #tpu.memory_space<vmem>>, vector<16x384xf32>,
    %c0_133 = arith.constant 0 : index
    %c128_134 = arith.constant 128 : index
    %156 = vector.load %arg17[%c0_133, %c128_134] : memref<16x640xf32, #tpu.memory_space<vmem>>, vector<16x384xf32>
    %c64_135 = arith.constant 64 : index
    %c0_136 = arith.constant 0 : index
    %157 = vector.load %arg16[%c64_135, %c0_136] : memref<144x384xf32, #tpu.memory_space<vmem>>, vector<16x384xf32>
    tpu.vector_store %arg16[%c64_135, %c0_136], %156 {strides = array<i32>} : memref<144x384xf32, #tpu.memory_space<vmem>>, vector<16x384xf32>,
    %c0_137 = arith.constant 0 : index
    %c129 = arith.constant 129 : index
    %158 = vector.load %arg17[%c0_137, %c129] : memref<16x640xf32, #tpu.memory_space<vmem>>, vector<16x384xf32>
    %c80_138 = arith.constant 80 : index
    %c0_139 = arith.constant 0 : index
    %159 = vector.load %arg16[%c80_138, %c0_139] : memref<144x384xf32, #tpu.memory_space<vmem>>, vector<16x384xf32>
    tpu.vector_store %arg16[%c80_138, %c0_139], %158 {strides = array<i32>} : memref<144x384xf32, #tpu.memory_space<vmem>>, vector<16x384xf32>,
    %c0_140 = arith.constant 0 : index
    %c151 = arith.constant 151 : index
    %160 = vector.load %arg17[%c0_140, %c151] : memref<16x640xf32, #tpu.memory_space<vmem>>, vector<16x384xf32>
    %c96_141 = arith.constant 96 : index
    %c0_142 = arith.constant 0 : index
    %161 = vector.load %arg16[%c96_141, %c0_142] : memref<144x384xf32, #tpu.memory_space<vmem>>, vector<16x384xf32>
    tpu.vector_store %arg16[%c96_141, %c0_142], %160 {strides = array<i32>} : memref<144x384xf32, #tpu.memory_space<vmem>>, vector<16x384xf32>,
    %c0_143 = arith.constant 0 : index
    %c152 = arith.constant 152 : index
    %162 = vector.load %arg17[%c0_143, %c152] : memref<16x640xf32, #tpu.memory_space<vmem>>, vector<16x384xf32>
    %c112 = arith.constant 112 : index
    %c0_144 = arith.constant 0 : index
    %163 = vector.load %arg16[%c112, %c0_144] : memref<144x384xf32, #tpu.memory_space<vmem>>, vector<16x384xf32>
    tpu.vector_store %arg16[%c112, %c0_144], %162 {strides = array<i32>} : memref<144x384xf32, #tpu.memory_space<vmem>>, vector<16x384xf32>,
    %c0_145 = arith.constant 0 : index
    %c153 = arith.constant 153 : index
    %164 = vector.load %arg17[%c0_145, %c153] : memref<16x640xf32, #tpu.memory_space<vmem>>, vector<16x384xf32>
    %c128_146 = arith.constant 128 : index
    %c0_147 = arith.constant 0 : index
    %165 = vector.load %arg16[%c128_146, %c0_147] : memref<144x384xf32, #tpu.memory_space<vmem>>, vector<16x384xf32>
    tpu.vector_store %arg16[%c128_146, %c0_147], %164 {strides = array<i32>} : memref<144x384xf32, #tpu.memory_space<vmem>>, vector<16x384xf32>,
    %c0_148 = arith.constant 0 : index
    %c0_149 = arith.constant 0 : index
    %166 = vector.load %arg3[%c0_148, %c0_149] : memref<4x144xf32, #tpu.memory_space<vmem>>, vector<4x144xf32>
    %c0_150 = arith.constant 0 : index
    %c0_151 = arith.constant 0 : index
    %167 = vector.load %arg16[%c0_150, %c0_151] : memref<144x384xf32, #tpu.memory_space<vmem>>, vector<144x384xf32>
    %cst_152 = arith.constant dense<0.000000e+00> : vector<4x384xf32>
    %168 = tpu.matmul %166, %167, %cst_152 {dimension_numbers = #tpu.dot_dimension_numbers<[1], [0], [0], [1], [0, 0, 1, 1], [], []>} : vector<4x144xf32>, vector<144x384xf32>, vector<4x384xf32> -> vector<4x384xf32>
    %c0_153 = arith.constant 0 : index
    %c0_154 = arith.constant 0 : index
    %169 = vector.load %arg6[%c0_153, %c0_154] : memref<4x1xf32, #tpu.memory_space<vmem>>, vector<4x1xf32>
    %170 = vector.broadcast %169 : vector<4x1xf32> to vector<4x384xf32>
    %171 = arith.addf %168, %170 : vector<4x384xf32>
    %172 = arith.mulf %109, %171 : vector<4x384xf32>
    %c0_155 = arith.constant 0 : index
    %c0_156 = arith.constant 0 : index
    %173 = vector.load %arg13[%c0_155, %c0_156] : memref<4x1xf32, #tpu.memory_space<vmem>>, vector<4x1xf32>
    %174 = vector.broadcast %173 : vector<4x1xf32> to vector<4x384xf32>
    %175 = arith.addf %172, %174 : vector<4x384xf32>
    %c0_157 = arith.constant 0 : index
    %c0_158 = arith.constant 0 : index
    %c0_159 = arith.constant 0 : index
    %176 = vector.load %arg14[%c0_157, %c0_158, %c0_159] : memref<1x4x384xf32, #tpu.memory_space<vmem>>, vector<1x4x384xf32>
    %177 = vector.shape_cast %176 : vector<1x4x384xf32> to vector<4x384xf32>
    %178 = vector.shape_cast %175 : vector<4x384xf32> to vector<1x4x384xf32>
    tpu.vector_store %arg14[%c0_157, %c0_158, %c0_159], %178 {strides = array<i32>} : memref<1x4x384xf32, #tpu.memory_space<vmem>>, vector<1x4x384xf32>,
    return
  }
  func.func @transform_0(%arg0: i32) -> (i32, i32, i32) {
    %c0_i32 = arith.constant 0 : i32
    %c0_i32_0 = arith.constant 0 : i32
    %c0_i32_1 = arith.constant 0 : i32
    return %arg0, %c0_i32, %c0_i32_0 : i32, i32, i32
  }
  func.func @transform_1(%arg0: i32) -> (i32, i32) {
    %c0_i32 = arith.constant 0 : i32
    %c0_i32_0 = arith.constant 0 : i32
    %c0_i32_1 = arith.constant 0 : i32
    return %c0_i32, %c0_i32_0 : i32, i32
  }
  func.func @transform_2(%arg0: i32) -> (i32, i32) {
    %c0_i32 = arith.constant 0 : i32
    %c0_i32_0 = arith.constant 0 : i32
    %c0_i32_1 = arith.constant 0 : i32
    return %c0_i32, %c0_i32_0 : i32, i32
  }
  func.func @transform_3(%arg0: i32) -> (i32, i32) {
    %c0_i32 = arith.constant 0 : i32
    %c0_i32_0 = arith.constant 0 : i32
    %c0_i32_1 = arith.constant 0 : i32
    return %c0_i32, %c0_i32_0 : i32, i32
  }
  func.func @transform_4(%arg0: i32) -> (i32, i32) {
    %c0_i32 = arith.constant 0 : i32
    %c0_i32_0 = arith.constant 0 : i32
    %c0_i32_1 = arith.constant 0 : i32
    return %c0_i32, %c0_i32_0 : i32, i32
  }
  func.func @transform_5(%arg0: i32) -> (i32, i32) {
    %c0_i32 = arith.constant 0 : i32
    %c0_i32_0 = arith.constant 0 : i32
    %c0_i32_1 = arith.constant 0 : i32
    return %c0_i32, %c0_i32_0 : i32, i32
  }
  func.func @transform_6(%arg0: i32) -> (i32, i32) {
    %c0_i32 = arith.constant 0 : i32
    %c0_i32_0 = arith.constant 0 : i32
    %c0_i32_1 = arith.constant 0 : i32
    return %c0_i32, %c0_i32_0 : i32, i32
  }
  func.func @transform_7(%arg0: i32) -> (i32, i32) {
    %c0_i32 = arith.constant 0 : i32
    %c0_i32_0 = arith.constant 0 : i32
    %c0_i32_1 = arith.constant 0 : i32
    return %c0_i32, %c0_i32_0 : i32, i32
  }
  func.func @transform_8(%arg0: i32) -> (i32, i32) {
    %c0_i32 = arith.constant 0 : i32
    %c0_i32_0 = arith.constant 0 : i32
    %c0_i32_1 = arith.constant 0 : i32
    return %c0_i32, %c0_i32_0 : i32, i32
  }
  func.func @transform_9(%arg0: i32) -> (i32, i32) {
    %c0_i32 = arith.constant 0 : i32
    %c0_i32_0 = arith.constant 0 : i32
    %c0_i32_1 = arith.constant 0 : i32
    return %c0_i32, %c0_i32_0 : i32, i32
  }
  func.func @transform_10(%arg0: i32) -> (i32, i32) {
    %c0_i32 = arith.constant 0 : i32
    %c0_i32_0 = arith.constant 0 : i32
    %c0_i32_1 = arith.constant 0 : i32
    return %c0_i32, %c0_i32_0 : i32, i32
  }
  func.func @transform_11(%arg0: i32) -> (i32, i32) {
    %c0_i32 = arith.constant 0 : i32
    %c0_i32_0 = arith.constant 0 : i32
    %c0_i32_1 = arith.constant 0 : i32
    return %c0_i32, %c0_i32_0 : i32, i32
  }
  func.func @transform_12(%arg0: i32) -> (i32, i32) {
    %c0_i32 = arith.constant 0 : i32
    %c0_i32_0 = arith.constant 0 : i32
    %c0_i32_1 = arith.constant 0 : i32
    return %c0_i32, %c0_i32_0 : i32, i32
  }
  func.func @transform_13(%arg0: i32) -> (i32, i32, i32) {
    %c0_i32 = arith.constant 0 : i32
    %c0_i32_0 = arith.constant 0 : i32
    %c0_i32_1 = arith.constant 0 : i32
    return %arg0, %c0_i32, %c0_i32_0 : i32, i32, i32
  }
}

</mosaic_0001>

<bundles_post_ra>
// kernel: _lambda_.1
= control target key start
LH: loop header
LB: loop body
LE: loop exit
PB: predicated region body
PF: predicated region fallthrough
CT: control target
= control target key end

     0   :  { %s2737_s25 = smov 0   ;;  %s3409_s0 = inlined_call_operand.vmem [shape: f32[2,4,512], index: 0, kind: input, shape index: {}]   ;;  %s3410_s1 = inlined_call_operand.vmem [shape: f32[20,100], index: 1, kind: input, shape index: {}]   ;;  %s3411_s2 = inlined_call_operand.vmem [shape: f32[4,144], index: 2, kind: input, shape index: {}]   ;;  %s3412_s3 = inlined_call_operand.vmem [shape: f32[1,384], index: 3, kind: input, shape index: {}]   ;;  %s3413_s4 = inlined_call_operand.vmem [shape: f32[16,1], index: 4, kind: input, shape index: {}]   ;;  %s3414_s5 = inlined_call_operand.vmem [shape: f32[4,1], index: 5, kind: input, shape index: {}]   ;;  %s3415_s6 = inlined_call_operand.vmem [shape: f32[4,1], index: 6, kind: input, shape index: {}]   ;;  %s3416_s7 = inlined_call_operand.vmem [shape: f32[16,1], index: 7, kind: input, shape index: {}]   ;;  %s3417_s8 = inlined_call_operand.vmem [shape: f32[4,1], index: 8, kind: input, shape index: {}]   ;;  %s3418_s9 = inlined_call_operand.vmem [shape: f32[4,1], index: 9, kind: input, shape index: {}]   ;;  %s3419_s10 = inlined_call_operand.vmem [shape: f32[16,1], index: 10, kind: input, shape index: {}]   ;;  %s3420_s11 = inlined_call_operand.vmem [shape: f32[16,1], index: 11, kind: input, shape index: {}]   ;;  %s3421_s12 = inlined_call_operand.vmem [shape: f32[4,1], index: 12, kind: input, shape index: {}]   ;;  %s3422_s13 = inlined_call_operand.vmem [shape: f32[2,4,384], index: 13, kind: output, shape index: {}]  }
   0x1 LB: > { %s2227_s26 = sadd.s32 4294967295, %s2632_s25   ;;  %p2231_p0 = scmp.ge.s32.totalorder %s2632_s25, 1  ;;  %s2632_s25 = sphi %s2737_s25, %s23_s25  }
   0x2   : > { %p387_p1 = scmp.lt.s32.totalorder %s2632_s25, 3 }
   0x4   : > { %p388_p2 = pnand %p2231_p0, %p387_p1 }
   0x5   : > { %p431_p3 = scmp.lt.s32.totalorder (!%p388_p2), %s2227_s26, 1  ;;  %s2634_s14 = smov (!%p388_p2), 126   ;;  %v2641_v7 = vmov (!%p388_p2), 0.0|0.0   ;;  %vm487_vm0 = vcmask (!%p388_p2), 1031168   ;;  %vm511_vm1 = vcmask (!%p388_p2), 1022976   ;;  %vm463_vm2 = vcmask (!%p388_p2), 1039360  }
   0x6   : > { %391 = sbr.rel (%p388_p2) target bundleno = 1005 (0x3ed), region = 72  ;;  %s2635_s15 = smov (!%p388_p2), 127   ;;  %2324 = vmatprep.subr.bf16.mxu1 (!%p388_p2), %v2641_v7  ;;  %vm535_vm3 = vcmask (!%p388_p2), 1014784   ;;  %vm559_vm4 = vcmask (!%p388_p2), 850944   ;;  %vm583_vm5 = vcmask (!%p388_p2), 842752   ;;  %vm607_vm6 = vcmask (!%p388_p2), 834560  }
   0x7   : > { %s2636_s16 = smov (!%p388_p2), 125   ;;  %s2637_s17 = smov (!%p388_p2), 124   ;;  %vm631_vm7 = vcmask (!%p388_p2), 826368   ;;  %vm655_vm8 = vcmask (!%p388_p2), 818176   ;;  %vm679_vm9 = vcmask (!%p388_p2), 654336   ;;  %vm703_vm10 = vcmask (!%p388_p2), 646144  }
   0x8   : > { %s2638_s18 = smov (!%p388_p2), 104   ;;  %s2639_s19 = smov (!%p388_p2), 103   ;;  %vm2660_vm11 = vmmov (!%p388_p2), 0   ;;  %vm727_vm12 = vcmask (!%p388_p2), 637952   ;;  %vm751_vm13 = vcmask (!%p388_p2), 629760   ;;  %vm775_vm14 = vcmask (!%p388_p2), 621568  }
   0x9   : > { %s2640_s20 = smov (!%p388_p2), 102   ;;  %s2642_s21 = smov (!%p388_p2), 101   ;;  %vm799_vm15 = vcmask (!%p388_p2), 457728  }
   0xa   : > { %s2643_s22 = smov (!%p388_p2), 100   ;;  %s2644_s23 = smov (!%p388_p2), 80  }
   0xb   : > { %s2645_s24 = smov (!%p388_p2), 79   ;;  %s2647_s28 = smov (!%p388_p2), 77  }
   0xc   : > { %s2648_s29 = smov (!%p388_p2), 76  }
   0xd   : > { %s3424_s26 = smov (!%p431_p3, %s2227_s26), 1 }
   0xe   : > { %s2248_s27 = sshll.u32 %s3424_s26, 4 }
   0xf   : > { %s435_s30 = scalar_lea.vmem %s3409_s0, %s2248_s27  ;;  %s2646_s27 = smov 78  }
  0x10   : > { %v2751_v0 = vld [vmem:[%s435_s30 + $0x8] sm:$0xff]  ;;  %v2753_v1 = vld [vmem:[%s435_s30] sm:$0xff] }
  0x11   : > { %483 = vrot.lane.b32.xlu1 %v2751_v0, %s2634_s14  ;;  %457 = vrot.lane.b32.xlu0 %v2753_v1, %s2635_s15  ;;  %v2761_v2 = vcombine.high %v2753_v1, %v2753_v1  ;;  %446 = vst [vmem:[#allocation2] sm:$0xf] %v2753_v1  ;;  %v2771_v3 = vcombine.low %v2751_v0, %v2751_v0  ;;  %v442_v5 = vld [vmem:[%s435_s30 + $0x8] sm:$0xf]  ;;  %s2649_s30 = smov 56  }
  0x12   : > { %v2775_v4 = vcombine.low %v2753_v1, %v2753_v1  ;;  %448 = vst [vmem:[#allocation2 + $0x10] sm:$0xf] %v442_v5  ;;  %v2811_v6 = vcombine.high %v2751_v0, %v2751_v0 }
  0x13   : > { %447 = vst [vmem:[#allocation2 + $0x8] sm:$0xf] %v2761_v2 }
  0x15   : > { %481 = vrot.lane.b32.xlu1 %v2761_v2, %s2634_s14  ;;  %505 = vrot.lane.b32.xlu0 %v2753_v1, %s2636_s16 }
  0x19   : > { %507 = vrot.lane.b32.xlu1 %v2771_v3, %s2636_s16  ;;  %459 = vrot.lane.b32.xlu0 %v2771_v3, %s2635_s15 }
  0x1d   : > { %479 = vrot.lane.b32.xlu1 %v2753_v1, %s2634_s14  ;;  %455 = vrot.lane.b32.xlu0 %v2775_v4, %s2635_s15 }
  0x21   : > { %529 = vrot.lane.b32.xlu1 %v2761_v2, %s2637_s17  ;;  %503 = vrot.lane.b32.xlu0 %v2775_v4, %s2636_s16 }
  0x25   : > { %553 = vrot.lane.b32.xlu1 %v2753_v1, %s2638_s18  ;;  %531 = vrot.lane.b32.xlu0 %v2751_v0, %s2637_s17 }
  0x29   : > { %577 = vrot.lane.b32.xlu1 %v2761_v2, %s2639_s19  ;;  %555 = vrot.lane.b32.xlu0 %v2771_v3, %s2638_s18 }
  0x2d   : > { %601 = vrot.lane.b32.xlu1 %v2753_v1, %s2640_s20  ;;  %579 = vrot.lane.b32.xlu0 %v2751_v0, %s2639_s19 }
  0x31   : > { %527 = vrot.lane.b32.xlu1 %v2753_v1, %s2637_s17  ;;  %603 = vrot.lane.b32.xlu0 %v2771_v3, %s2640_s20 }
  0x35   : > { %575 = vrot.lane.b32.xlu1 %v2753_v1, %s2639_s19  ;;  %551 = vrot.lane.b32.xlu0 %v2775_v4, %s2638_s18 }
  0x39   : > { %461 = vrot.lane.b32.xlu1 %v2751_v0, %s2635_s15  ;;  %599 = vrot.lane.b32.xlu0 %v2775_v4, %s2640_s20 }
  0x3d   : > { %509 = vrot.lane.b32.xlu1 %v2751_v0, %s2636_s16  ;;  %485 = vrot.lane.b32.xlu0 %v2811_v6, %s2634_s14  ;;  %s2650_s14 = smov 55   ;;  %s2651_s16 = smov 54  }
  0x41   : > { %627 = vrot.lane.b32.xlu1 %v2751_v0, %s2642_s21  ;;  %625 = vrot.lane.b32.xlu0 %v2761_v2, %s2642_s21 }
  0x45   : > { %651 = vrot.lane.b32.xlu1 %v2771_v3, %s2643_s22  ;;  %649 = vrot.lane.b32.xlu0 %v2753_v1, %s2643_s22 }
  0x49   : > { %675 = vrot.lane.b32.xlu1 %v2751_v0, %s2644_s23  ;;  %673 = vrot.lane.b32.xlu0 %v2761_v2, %s2644_s23 }
  0x4d   : > { %699 = vrot.lane.b32.xlu1 %v2771_v3, %s2645_s24  ;;  %697 = vrot.lane.b32.xlu0 %v2753_v1, %s2645_s24 }
  0x51   : > { %647 = vrot.lane.b32.xlu1 %v2775_v4, %s2643_s22  ;;  %623 = vrot.lane.b32.xlu0 %v2753_v1, %s2642_s21 }
  0x55   : > { %695 = vrot.lane.b32.xlu1 %v2775_v4, %s2645_s24  ;;  %671 = vrot.lane.b32.xlu0 %v2753_v1, %s2644_s23 }
  0x59   : > { %557 = vrot.lane.b32.xlu1 %v2751_v0, %s2638_s18  ;;  %533 = vrot.lane.b32.xlu0 %v2811_v6, %s2637_s17  ;;  %s2652_s17 = smov 53  }
  0x5d   : > { %605 = vrot.lane.b32.xlu1 %v2751_v0, %s2640_s20  ;;  %581 = vrot.lane.b32.xlu0 %v2811_v6, %s2639_s19  ;;  %s2653_s20 = smov 52  }
  0x61   : > { %723 = vrot.lane.b32.xlu1 %v2751_v0, %s2646_s27  ;;  %721 = vrot.lane.b32.xlu0 %v2761_v2, %s2646_s27 }
  0x65   : > { %747 = vrot.lane.b32.xlu1 %v2771_v3, %s2647_s28  ;;  %745 = vrot.lane.b32.xlu0 %v2753_v1, %s2647_s28 }
  0x69   : > { %771 = vrot.lane.b32.xlu1 %v2751_v0, %s2648_s29  ;;  %769 = vrot.lane.b32.xlu0 %v2761_v2, %s2648_s29 }
  0x6d   : > { %795 = vrot.lane.b32.xlu1 %v2771_v3, %s2649_s30  ;;  %793 = vrot.lane.b32.xlu0 %v2753_v1, %s2649_s30 }
  0x71   : > { %743 = vrot.lane.b32.xlu1 %v2775_v4, %s2647_s28  ;;  %719 = vrot.lane.b32.xlu0 %v2753_v1, %s2646_s27 }
  0x75   : > { %791 = vrot.lane.b32.xlu1 %v2775_v4, %s2649_s30  ;;  %767 = vrot.lane.b32.xlu0 %v2753_v1, %s2648_s29 }
  0x79   : > { %653 = vrot.lane.b32.xlu1 %v2751_v0, %s2643_s22  ;;  %629 = vrot.lane.b32.xlu0 %v2811_v6, %s2642_s21  ;;  %s2654_s21 = smov 32   ;;  %s2655_s22 = smov 31  }
  0x7d   : > { %701 = vrot.lane.b32.xlu1 %v2751_v0, %s2645_s24  ;;  %677 = vrot.lane.b32.xlu0 %v2811_v6, %s2644_s23  ;;  %s2656_s23 = smov 30   ;;  %s2657_s24 = smov 29  }
  0x81   : > { %819 = vrot.lane.b32.xlu1 %v2751_v0, %s2650_s14  ;;  %817 = vrot.lane.b32.xlu0 %v2761_v2, %s2650_s14 }
  0x83   : > { %v2886_v8 = vpop.permute.xlu1 %483  ;;  %v458_v9 = vpop.permute.xlu0 %457 }
  0x85   : > { %843 = vrot.lane.b32.xlu1 %v2771_v3, %s2651_s16  ;;  %841 = vrot.lane.b32.xlu0 %v2753_v1, %s2651_s16 }
  0x87   : > { %v482_v10 = vpop.permute.xlu1 %481  ;;  %v506_v11 = vpop.permute.xlu0 %505 }
  0x88   : > { %v489_v12 = vsel %vm487_vm0, %v482_v10, %v2886_v8 }
  0x89   : > { %495 = vst [vmem:[#allocation2 + $0x20] sm:$0xf] %v489_v12  ;;  %867 = vrot.lane.b32.xlu1 %v2751_v0, %s2652_s17  ;;  %865 = vrot.lane.b32.xlu0 %v2761_v2, %s2652_s17 }
  0x8b   : > { %v2898_v13 = vpop.permute.xlu1 %507  ;;  %v2900_v14 = vpop.permute.xlu0 %459 }
  0x8c   : > { %v513_v15 = vsel %vm511_vm1, %v506_v11, %v2898_v13  ;;  %v465_v16 = vsel %vm463_vm2, %v458_v9, %v2900_v14 }
  0x8d   : > { %519 = vst [vmem:[#allocation2 + $0x20] sm:$0xf0] %v513_v15  ;;  %471 = vst [vmem:[#allocation2 + $0x8] sm:$0xf0] %v465_v16  ;;  %891 = vrot.lane.b32.xlu1 %v2771_v3, %s2653_s20  ;;  %889 = vrot.lane.b32.xlu0 %v2753_v1, %s2653_s20 }
  0x8f   : > { %v480_v17 = vpop.permute.xlu1 %479  ;;  %v456_v18 = vpop.permute.xlu0 %455 }
  0x90   : > { %v488_v19 = vsel %vm487_vm0, %v480_v17, %v482_v10  ;;  %v464_v20 = vsel %vm463_vm2, %v456_v18, %v458_v9 }
  0x91   : > { %494 = vst [vmem:[#allocation2 + $0x18] sm:$0xf] %v488_v19  ;;  %470 = vst [vmem:[#allocation2] sm:$0xf0] %v464_v20  ;;  %839 = vrot.lane.b32.xlu1 %v2775_v4, %s2651_s16  ;;  %815 = vrot.lane.b32.xlu0 %v2753_v1, %s2650_s14 }
  0x93   : > { %v530_v21 = vpop.permute.xlu1 %529  ;;  %v504_v22 = vpop.permute.xlu0 %503 }
  0x94   : > { %v512_v23 = vsel %vm511_vm1, %v504_v22, %v506_v11  ;;  %v1029_v24 = vld [vmem:[#allocation2 + $0x8] sm:$0xff]  ;;  %v1032_v25 = vld [vmem:[#allocation2 + $0x20] sm:$0xff] }
  0x95   : > { %518 = vst [vmem:[#allocation2 + $0x18] sm:$0xf0] %v512_v23  ;;  %887 = vrot.lane.b32.xlu1 %v2775_v4, %s2653_s20  ;;  %863 = vrot.lane.b32.xlu0 %v2753_v1, %s2652_s17  ;;  %v2300_v26 = vpack.c.bf16 %v1032_v25, %v1029_v24 }
  0x97   : > { %v554_v27 = vpop.permute.xlu1 %553  ;;  %v2921_v28 = vpop.permute.xlu0 %531  ;;  %2301 = vmatprep.subr.bf16.mxu0 %v2300_v26 }
  0x98   : > { %v537_v29 = vsel %vm535_vm3, %v530_v21, %v2921_v28  ;;  %v1028_v33 = vld [vmem:[#allocation2] sm:$0xff] }
  0x99   : > { %543 = vst [vmem:[#allocation2 + $0x38] sm:$0xf] %v537_v29  ;;  %749 = vrot.lane.b32.xlu1 %v2751_v0, %s2647_s28  ;;  %725 = vrot.lane.b32.xlu0 %v2811_v6, %s2646_s27  ;;  %s2659_s27 = smov 28   ;;  %s2664_s28 = smov 23  }
  0x9b   : > { %v578_v30 = vpop.permute.xlu1 %577  ;;  %v2929_v31 = vpop.permute.xlu0 %555 }
  0x9c   : > { %v561_v32 = vsel %vm559_vm4, %v554_v27, %v2929_v31  ;;  %v1031_v34 = vld [vmem:[#allocation2 + $0x18] sm:$0xff] }
  0x9d   : > { %567 = vst [vmem:[#allocation2 + $0x38] sm:$0xf0] %v561_v32  ;;  %797 = vrot.lane.b32.xlu1 %v2751_v0, %s2649_s30  ;;  %773 = vrot.lane.b32.xlu0 %v2811_v6, %s2648_s29  ;;  %v2302_v35 = vpack.c.bf16 %v1031_v34, %v1028_v33  ;;  %s2665_s29 = smov 1   ;;  %s2666_s30 = smov 105  }
  0x9f   : > { %v602_v36 = vpop.permute.xlu1 %601  ;;  %v2937_v37 = vpop.permute.xlu0 %579  ;;  %2303 = vmatpush1.bf16.msra.mxu0 %v2302_v35 }
  0xa0   : > { %v585_v38 = vsel %vm583_vm5, %v578_v30, %v2937_v37 }
  0xa1   : > { %591 = vst [vmem:[#allocation2 + $0x50] sm:$0xf] %v585_v38  ;;  %915 = vrot.lane.b32.xlu1 %v2751_v0, %s2654_s21  ;;  %913 = vrot.lane.b32.xlu0 %v2761_v2, %s2654_s21 }
  0xa3   : > { %v528_v39 = vpop.permute.xlu1 %527  ;;  %v2945_v40 = vpop.permute.xlu0 %603 }
  0xa4   : > { %v536_v41 = vsel %vm535_vm3, %v528_v39, %v530_v21  ;;  %v609_v42 = vsel %vm607_vm6, %v602_v36, %v2945_v40  ;;  %v1035_v51 = vld [vmem:[#allocation2 + $0x38] sm:$0xff]  ;;  %v2658_v21 = vmov 0.0  }
  0xa5   : > { %542 = vst [vmem:[#allocation2 + $0x30] sm:$0xf] %v536_v41  ;;  %615 = vst [vmem:[#allocation2 + $0x50] sm:$0xf0] %v609_v42  ;;  %939 = vrot.lane.b32.xlu1 %v2771_v3, %s2655_s22  ;;  %937 = vrot.lane.b32.xlu0 %v2753_v1, %s2655_s22  ;;  %v1358_v41 = vld [vmem:[%s3419_s10] sm:$0xff]  ;;  %v1359_v42 = vld [vmem:[%s3419_s10 + $0x8] sm:$0xff] }
  0xa6   : > { %1150 = vmatprep.mubr.f32.mxu0 %v2658_v21  ;;  %2291 = vmatprep.mubr.msk.f32.mxu1 %vm2660_vm11, %v2658_v21 }
  0xa7   : > { %v576_v43 = vpop.permute.xlu1 %575  ;;  %v552_v44 = vpop.permute.xlu0 %551 }
  0xa8   : > { %v584_v45 = vsel %vm583_vm5, %v576_v43, %v578_v30  ;;  %v560_v46 = vsel %vm559_vm4, %v552_v44, %v554_v27  ;;  %v1360_v44 = vld [vmem:[%s3420_s11] sm:$0xff] }
  0xa9   : > { %590 = vst [vmem:[#allocation2 + $0x48] sm:$0xf] %v584_v45  ;;  %566 = vst [vmem:[#allocation2 + $0x30] sm:$0xf0] %v560_v46  ;;  %963 = vrot.lane.b32.xlu1 %v2751_v0, %s2656_s23  ;;  %961 = vrot.lane.b32.xlu0 %v2761_v2, %s2656_s23  ;;  %v1361_v45 = vld [vmem:[%s3420_s11 + $0x8] sm:$0xff] }
  0xab   : > { %v462_v47 = vpop.permute.xlu1 %461  ;;  %v600_v48 = vpop.permute.xlu0 %599 }
  0xac   : > { %v466_v49 = vsel %vm463_vm2, %v2900_v14, %v462_v47  ;;  %v608_v50 = vsel %vm607_vm6, %v600_v48, %v602_v36  ;;  %v1038_v52 = vld [vmem:[#allocation2 + $0x50] sm:$0xff] }
  0xad   : > { %472 = vst [vmem:[#allocation2 + $0x10] sm:$0xf0] %v466_v49  ;;  %614 = vst [vmem:[#allocation2 + $0x48] sm:$0xf0] %v608_v50  ;;  %987 = vrot.lane.b32.xlu1 %v2771_v3, %s2657_s24  ;;  %985 = vrot.lane.b32.xlu0 %v2753_v1, %s2657_s24  ;;  %v2304_v53 = vpack.c.bf16 %v1038_v52, %v1035_v51  ;;  %v1467_v52 = vld [vmem:[%s3416_s7] sm:$0xff] }
  0xaf   : > { %v510_v54 = vpop.permute.xlu1 %509  ;;  %v486_v55 = vpop.permute.xlu0 %485  ;;  %2305 = vmatprep.subr.bf16.mxu0 %v2304_v53  ;;  %v1468_v53 = vld [vmem:[%s3416_s7 + $0x8] sm:$0xff] }
  0xb0   : > { %v514_v56 = vsel %vm511_vm1, %v2898_v13, %v510_v54  ;;  %v490_v57 = vsel %vm487_vm0, %v2886_v8, %v486_v55  ;;  %v1034_v61 = vld [vmem:[#allocation2 + $0x30] sm:$0xff]  ;;  %vm823_vm0 = vcmask 449536   ;;  %vm847_vm1 = vcmask 441344  }
  0xb1   : > { %520 = vst [vmem:[#allocation2 + $0x28] sm:$0xf0] %v514_v56  ;;  %496 = vst [vmem:[#allocation2 + $0x28] sm:$0xf] %v490_v57  ;;  %935 = vrot.lane.b32.xlu1 %v2775_v4, %s2655_s22  ;;  %911 = vrot.lane.b32.xlu0 %v2753_v1, %s2654_s21 }
  0xb3   : > { %v2975_v58 = vpop.permute.xlu1 %627  ;;  %v626_v59 = vpop.permute.xlu0 %625 }
  0xb4   : > { %v633_v60 = vsel %vm631_vm7, %v626_v59, %v2975_v58  ;;  %v1037_v62 = vld [vmem:[#allocation2 + $0x48] sm:$0xff]  ;;  %v1030_v9 = vld [vmem:[#allocation2 + $0x10] sm:$0xff] }
  0xb5   : > { %639 = vst [vmem:[#allocation2 + $0x68] sm:$0xf] %v633_v60  ;;  %983 = vrot.lane.b32.xlu1 %v2775_v4, %s2657_s24  ;;  %959 = vrot.lane.b32.xlu0 %v2753_v1, %s2656_s23  ;;  %v2306_v63 = vpack.c.bf16 %v1037_v62, %v1034_v61 }
  0xb7   : > { %v2983_v3 = vpop.permute.xlu1 %651  ;;  %v650_v5 = vpop.permute.xlu0 %649  ;;  %2307 = vmatpush1.bf16.msra.mxu0 %v2306_v63 }
  0xb8   : > { %v657_v8 = vsel %vm655_vm8, %v650_v5, %v2983_v3  ;;  %v1033_v10 = vld [vmem:[#allocation2 + $0x28] sm:$0xff] }
  0xb9   : > { %663 = vst [vmem:[#allocation2 + $0x68] sm:$0xf0] %v657_v8  ;;  %845 = vrot.lane.b32.xlu1 %v2751_v0, %s2651_s16  ;;  %821 = vrot.lane.b32.xlu0 %v2811_v6, %s2650_s14  ;;  %v2325_v4 = vpack.c.bf16 %v1033_v10, %v1030_v9 }
  0xbb   : > { %v2991_v11 = vpop.permute.xlu1 %675  ;;  %v674_v12 = vpop.permute.xlu0 %673  ;;  %2326 = vmatpush3.bf16.msra.mxu1 %v2325_v4 }
  0xbc   : > { %v681_v13 = vsel %vm679_vm9, %v674_v12, %v2991_v11  ;;  %2327 = vmatprep.subr.bf16.mxu1 %v2641_v7 }
  0xbd   : > { %687 = vst [vmem:[#allocation2 + $0x80] sm:$0xf] %v681_v13  ;;  %893 = vrot.lane.b32.xlu1 %v2751_v0, %s2653_s20  ;;  %869 = vrot.lane.b32.xlu0 %v2811_v6, %s2652_s17 }
  0xbf   : > { %v3000_v14 = vpop.permute.xlu1 %699  ;;  %v698_v15 = vpop.permute.xlu0 %697 }
  0xc0   : > { %v705_v16 = vsel %vm703_vm10, %v698_v15, %v3000_v14  ;;  %v1041_v26 = vld [vmem:[#allocation2 + $0x68] sm:$0xff] }
  0xc1   : > { %711 = vst [vmem:[#allocation2 + $0x80] sm:$0xf0] %v705_v16  ;;  %941 = vrot.lane.b32.xlu1 %v2751_v0, %s2655_s22  ;;  %917 = vrot.lane.b32.xlu0 %v2811_v6, %s2654_s21 }
  0xc3   : > { %v648_v17 = vpop.permute.xlu1 %647  ;;  %v624_v18 = vpop.permute.xlu0 %623 }
  0xc4   : > { %v656_v19 = vsel %vm655_vm8, %v648_v17, %v650_v5  ;;  %v632_v20 = vsel %vm631_vm7, %v624_v18, %v626_v59 }
  0xc5   : > { %662 = vst [vmem:[#allocation2 + $0x60] sm:$0xf0] %v656_v19  ;;  %638 = vst [vmem:[#allocation2 + $0x60] sm:$0xf] %v632_v20  ;;  %989 = vrot.lane.b32.xlu1 %v2751_v0, %s2657_s24  ;;  %965 = vrot.lane.b32.xlu0 %v2811_v6, %s2656_s23  ;;  %s2662_s24 = smov 25  }
  0xc7   : > { %v696_v22 = vpop.permute.xlu1 %695  ;;  %v672_v23 = vpop.permute.xlu0 %671 }
  0xc8   : > { %v704_v24 = vsel %vm703_vm10, %v696_v22, %v698_v15  ;;  %v680_v25 = vsel %vm679_vm9, %v672_v23, %v674_v12  ;;  %v1044_v27 = vld [vmem:[#allocation2 + $0x80] sm:$0xff] }
  0xc9   : > { %710 = vst [vmem:[#allocation2 + $0x78] sm:$0xf0] %v704_v24  ;;  %686 = vst [vmem:[#allocation2 + $0x78] sm:$0xf] %v680_v25  ;;  %1011 = vrot.lane.b32.xlu1 %v2751_v0, %s2659_s27  ;;  %1009 = vrot.lane.b32.xlu0 %v2761_v2, %s2659_s27  ;;  %v2308_v29 = vpack.c.bf16 %v1044_v27, %v1041_v26  ;;  %v1250_v0 = vld [vmem:[%s3413_s4 + $0x8] sm:$0xff]  ;;  %v1249_v2 = vld [vmem:[%s3413_s4] sm:$0xff] }
  0xcb   : > { %v558_v30 = vpop.permute.xlu1 %557  ;;  %v534_v32 = vpop.permute.xlu0 %533  ;;  %2309 = vmatprep.subr.bf16.mxu0 %v2308_v29 }
  0xcc   : > { %v562_v33 = vsel %vm559_vm4, %v2929_v31, %v558_v30  ;;  %v538_v34 = vsel %vm535_vm3, %v2921_v28, %v534_v32  ;;  %v2661_v31 = vmov 0   ;;  %vm871_vm3 = vcmask 433152  }
  0xcd   : > { %568 = vst [vmem:[#allocation2 + $0x40] sm:$0xf0] %v562_v33  ;;  %544 = vst [vmem:[#allocation2 + $0x40] sm:$0xf] %v538_v34  ;;  %1013 = vrot.lane.b32.xlu1 %v2811_v6, %s2659_s27  ;;  %1007 = vrot.lane.b32.xlu0 %v2753_v1, %s2659_s27  ;;  %v1040_v1 = vld [vmem:[#allocation2 + $0x60] sm:$0xff]  ;;  %s2663_s27 = smov 24  }
  0xce   : > { %2448 = vset.pattern.permute.xlu1 %v2661_v31  ;;  %2447 = vset.pattern.permute.xlu0 %v2661_v31 }
  0xcf   : > { %v606_v35 = vpop.permute.xlu1 %605  ;;  %v582_v36 = vpop.permute.xlu0 %581 }
  0xd0   : > { %v610_v28 = vsel %vm607_vm6, %v2945_v40, %v606_v35  ;;  %v586_v6 = vsel %vm583_vm5, %v2937_v37, %v582_v36  ;;  %v1043_v38 = vld [vmem:[#allocation2 + $0x78] sm:$0xff]  ;;  %vm895_vm6 = vcmask 424960  }
  0xd1   : > { %616 = vst [vmem:[#allocation2 + $0x58] sm:$0xf0] %v610_v28  ;;  %592 = vst [vmem:[#allocation2 + $0x58] sm:$0xf] %v586_v6  ;;  %v2310_v39 = vpack.c.bf16 %v1043_v38, %v1040_v1  ;;  %1258 = vperm.xlu1 %2448, %v1250_v0   ;;  %1253 = vperm.xlu0 %2447, %v1249_v2  }
  0xd3   : > { %v3043_v40 = vpop.permute.xlu1 %723  ;;  %v722_v43 = vpop.permute.xlu0 %721  ;;  %2311 = vmatpush1.bf16.msra.mxu0 %v2310_v39 }
  0xd4   : > { %v729_v37 = vsel %vm727_vm12, %v722_v43, %v3043_v40  ;;  %v1036_v49 = vld [vmem:[#allocation2 + $0x40] sm:$0xff] }
  0xd5   : > { %735 = vst [vmem:[#allocation2 + $0x98] sm:$0xf] %v729_v37  ;;  %1437 = vperm.xlu1 %2448, %v1358_v41   ;;  %1442 = vperm.xlu0 %2447, %v1359_v42  }
  0xd7   : > { %v3053_v46 = vpop.permute.xlu1 %747  ;;  %v746_v47 = vpop.permute.xlu0 %745 }
  0xd8   : > { %v753_v48 = vsel %vm751_vm13, %v746_v47, %v3053_v46  ;;  %v1039_v50 = vld [vmem:[#allocation2 + $0x58] sm:$0xff] }
  0xd9   : > { %759 = vst [vmem:[#allocation2 + $0x98] sm:$0xf0] %v753_v48  ;;  %v2328_v51 = vpack.c.bf16 %v1039_v50, %v1036_v49  ;;  %1453 = vperm.xlu1 %2448, %v1360_v44   ;;  %1458 = vperm.xlu0 %2447, %v1361_v45  }
  0xdb   : > { %v3063_v54 = vpop.permute.xlu1 %771  ;;  %v770_v55 = vpop.permute.xlu0 %769  ;;  %2329 = vmatpush3.bf16.msra.mxu1 %v2328_v51 }
  0xdc   : > { %v777_v56 = vsel %vm775_vm14, %v770_v55, %v3063_v54  ;;  %2330 = vmatprep.subr.bf16.mxu1 %v2641_v7 }
  0xdd   : > { %783 = vst [vmem:[#allocation2 + $0xb0] sm:$0xf] %v777_v56  ;;  %1477 = vperm.xlu1 %2448, %v1467_v52   ;;  %1482 = vperm.xlu0 %2447, %v1468_v53  }
  0xdf   : > { %v3068_v57 = vpop.permute.xlu1 %795  ;;  %v794_v59 = vpop.permute.xlu0 %793 }
  0xe0   : > { %v801_v60 = vsel %vm799_vm15, %v794_v59, %v3068_v57  ;;  %v1047_v12 = vld [vmem:[#allocation2 + $0x98] sm:$0xff] }
  0xe1   : > { %807 = vst [vmem:[#allocation2 + $0xb0] sm:$0xf0] %v801_v60  ;;  %2450 = vrot.lane.b32.xlu1 %v2658_v21, %s2662_s24  ;;  %2470 = vrot.lane.b32.xlu0 %v2658_v21, %s2635_s15 }
  0xe3   : > { %v744_v61 = vpop.permute.xlu1 %743  ;;  %v720_v62 = vpop.permute.xlu0 %719 }
  0xe4   : > { %v752_v63 = vsel %vm751_vm13, %v744_v61, %v746_v47  ;;  %v728_v5 = vsel %vm727_vm12, %v720_v62, %v722_v43 }
  0xe5   : > { %758 = vst [vmem:[#allocation2 + $0x90] sm:$0xf0] %v752_v63  ;;  %734 = vst [vmem:[#allocation2 + $0x90] sm:$0xf] %v728_v5  ;;  %2455 = vrot.lane.b32.xlu1 %v2658_v21, %s2663_s27  ;;  %2475 = vrot.lane.b32.xlu0 %v2658_v21, %s2666_s30 }
  0xe7   : > { %v792_v8 = vpop.permute.xlu1 %791  ;;  %v768_v9 = vpop.permute.xlu0 %767 }
  0xe8   : > { %v800_v10 = vsel %vm799_vm15, %v792_v8, %v794_v59  ;;  %v776_v4 = vsel %vm775_vm14, %v768_v9, %v770_v55  ;;  %v1050_v13 = vld [vmem:[#allocation2 + $0xb0] sm:$0xff] }
  0xe9   : > { %806 = vst [vmem:[#allocation2 + $0xa8] sm:$0xf0] %v800_v10  ;;  %782 = vst [vmem:[#allocation2 + $0xa8] sm:$0xf] %v776_v4  ;;  %v2312_v15 = vpack.c.bf16 %v1050_v13, %v1047_v12  ;;  %2460 = vrot.lane.b32.xlu1 %v2658_v21, %s2664_s28 }
  0xeb   : > { %v654_v16 = vpop.permute.xlu1 %653  ;;  %v630_v17 = vpop.permute.xlu0 %629  ;;  %2313 = vmatprep.subr.bf16.mxu0 %v2312_v15 }
  0xec   : > { %v658_v18 = vsel %vm655_vm8, %v2983_v3, %v654_v16  ;;  %v634_v19 = vsel %vm631_vm7, %v2975_v58, %v630_v17  ;;  %v1046_v25 = vld [vmem:[#allocation2 + $0x90] sm:$0xff]  ;;  %vm919_vm7 = vcmask 261120  }
  0xed   : > { %664 = vst [vmem:[#allocation2 + $0x70] sm:$0xf0] %v658_v18  ;;  %640 = vst [vmem:[#allocation2 + $0x70] sm:$0xf] %v634_v19  ;;  %2465 = vrot.lane.b32.xlu1 %v2658_v21, %s2665_s29 }
  0xef   : > { %v702_v20 = vpop.permute.xlu1 %701  ;;  %v678_v22 = vpop.permute.xlu0 %677 }
  0xf0   : > { %v706_v23 = vsel %vm703_vm10, %v3000_v14, %v702_v20  ;;  %v682_v24 = vsel %vm679_vm9, %v2991_v11, %v678_v22  ;;  %v1049_v26 = vld [vmem:[#allocation2 + $0xa8] sm:$0xff]  ;;  %vm943_vm9 = vcmask 252928   ;;  %vm967_vm10 = vcmask 244736  }
  0xf1   : > { %712 = vst [vmem:[#allocation2 + $0x88] sm:$0xf0] %v706_v23  ;;  %688 = vst [vmem:[#allocation2 + $0x88] sm:$0xf] %v682_v24  ;;  %v2314_v27 = vpack.c.bf16 %v1049_v26, %v1046_v25 }
  0xf3   : > { %v3084_v3 = vpop.permute.xlu1 %819  ;;  %v818_v29 = vpop.permute.xlu0 %817  ;;  %2315 = vmatpush1.bf16.msra.mxu0 %v2314_v27 }
  0xf4   : > { %v825_v58 = vsel %vm823_vm0, %v818_v29, %v3084_v3  ;;  %v1042_v32 = vld [vmem:[#allocation2 + $0x70] sm:$0xff] }
  0xf5   : > { %831 = vst [vmem:[#allocation2 + $0xc8] sm:$0xf] %v825_v58 }
  0xf7   : > { %v3088_v30 = vpop.permute.xlu1 %843  ;;  %v842_v14 = vpop.permute.xlu0 %841 }
  0xf8   : > { %v849_v11 = vsel %vm847_vm1, %v842_v14, %v3088_v30  ;;  %v1045_v33 = vld [vmem:[#allocation2 + $0x88] sm:$0xff] }
  0xf9   : > { %855 = vst [vmem:[#allocation2 + $0xc8] sm:$0xf0] %v849_v11  ;;  %v2331_v34 = vpack.c.bf16 %v1045_v33, %v1042_v32 }
  0xfb   : > { %v3092_v0 = vpop.permute.xlu1 %867  ;;  %v866_v2 = vpop.permute.xlu0 %865  ;;  %2332 = vmatpush3.bf16.msra.mxu1 %v2331_v34 }
  0xfc   : > { %v873_v35 = vsel %vm871_vm3, %v866_v2, %v3092_v0  ;;  %2333 = vmatprep.subr.bf16.mxu1 %v2641_v7 }
  0xfd   : > { %879 = vst [vmem:[#allocation2 + $0xe0] sm:$0xf] %v873_v35 }
  0xff   : > { %v3097_v36 = vpop.permute.xlu1 %891  ;;  %v890_v31 = vpop.permute.xlu0 %889 }
 0x100   : > { %v897_v28 = vsel %vm895_vm6, %v890_v31, %v3097_v36  ;;  %v1053_v44 = vld [vmem:[#allocation2 + $0xc8] sm:$0xff] }
 0x101   : > { %903 = vst [vmem:[#allocation2 + $0xe0] sm:$0xf0] %v897_v28 }
 0x103   : > { %v840_v6 = vpop.permute.xlu1 %839  ;;  %v816_v1 = vpop.permute.xlu0 %815 }
 0x104   : > { %v848_v38 = vsel %vm847_vm1, %v840_v6, %v842_v14  ;;  %v824_v39 = vsel %vm823_vm0, %v816_v1, %v818_v29 }
 0x105   : > { %854 = vst [vmem:[#allocation2 + $0xc0] sm:$0xf0] %v848_v38  ;;  %830 = vst [vmem:[#allocation2 + $0xc0] sm:$0xf] %v824_v39 }
 0x107   : > { %v888_v41 = vpop.permute.xlu1 %887  ;;  %v864_v42 = vpop.permute.xlu0 %863 }
 0x108   : > { %v896_v43 = vsel %vm895_vm6, %v888_v41, %v890_v31  ;;  %v872_v37 = vsel %vm871_vm3, %v864_v42, %v866_v2  ;;  %v1056_v45 = vld [vmem:[#allocation2 + $0xe0] sm:$0xff] }
 0x109   : > { %902 = vst [vmem:[#allocation2 + $0xd8] sm:$0xf0] %v896_v43  ;;  %878 = vst [vmem:[#allocation2 + $0xd8] sm:$0xf] %v872_v37  ;;  %v2316_v47 = vpack.c.bf16 %v1056_v45, %v1053_v44 }
 0x10b   : > { %v750_v48 = vpop.permute.xlu1 %749  ;;  %v726_v49 = vpop.permute.xlu0 %725  ;;  %2317 = vmatprep.subr.bf16.mxu0 %v2316_v47 }
 0x10c   : > { %v754_v50 = vsel %vm751_vm13, %v3053_v46, %v750_v48  ;;  %v730_v51 = vsel %vm727_vm12, %v3043_v40, %v726_v49  ;;  %v1052_v59 = vld [vmem:[#allocation2 + $0xc0] sm:$0xff]  ;;  %vm991_vm12 = vcmask 236544   ;;  %vm1015_vm13 = vcmask 228352  }
 0x10d   : > { %760 = vst [vmem:[#allocation2 + $0xa0] sm:$0xf0] %v754_v50  ;;  %736 = vst [vmem:[#allocation2 + $0xa0] sm:$0xf] %v730_v51 }
 0x10f   : > { %v798_v52 = vpop.permute.xlu1 %797  ;;  %v774_v53 = vpop.permute.xlu0 %773 }
 0x110   : > { %v802_v55 = vsel %vm799_vm15, %v3068_v57, %v798_v52  ;;  %v778_v56 = vsel %vm775_vm14, %v3063_v54, %v774_v53  ;;  %v1055_v60 = vld [vmem:[#allocation2 + $0xd8] sm:$0xff]  ;;  %vm1076_vm14 = vcmask 1043456  }
 0x111   : > { %808 = vst [vmem:[#allocation2 + $0xb8] sm:$0xf0] %v802_v55  ;;  %784 = vst [vmem:[#allocation2 + $0xb8] sm:$0xf] %v778_v56  ;;  %v2318_v61 = vpack.c.bf16 %v1055_v60, %v1052_v59  ;;  %v1025_v59 = vld [vmem:[%s3410_s1] sm:$0xff] }
 0x113   : > { %v916_v46 = vpop.permute.xlu1 %915  ;;  %v914_v62 = vpop.permute.xlu0 %913  ;;  %2319 = vmatpush1.bf16.msra.mxu0 %v2318_v61 }
 0x114   : > { %v921_v40 = vsel %vm919_vm7, %v914_v62, %v916_v46  ;;  %v1048_v8 = vld [vmem:[#allocation2 + $0xa0] sm:$0xff] }
 0x115   : > { %927 = vst [vmem:[#allocation2 + $0xf8] sm:$0xf] %v921_v40 }
 0x117   : > { %v940_v63 = vpop.permute.xlu1 %939  ;;  %v938_v5 = vpop.permute.xlu0 %937 }
 0x118   : > { %v945_v57 = vsel %vm943_vm9, %v938_v5, %v940_v63  ;;  %v1051_v9 = vld [vmem:[#allocation2 + $0xb8] sm:$0xff] }
 0x119   : > { %951 = vst [vmem:[#allocation2 + $0xf8] sm:$0xf0] %v945_v57  ;;  %v2334_v54 = vpack.c.bf16 %v1051_v9, %v1048_v8 }
 0x11b   : > { %v964_v10 = vpop.permute.xlu1 %963  ;;  %v962_v4 = vpop.permute.xlu0 %961  ;;  %2335 = vmatpush3.bf16.msra.mxu1 %v2334_v54 }
 0x11c   : > { %v969_v12 = vsel %vm967_vm10, %v962_v4, %v964_v10  ;;  %2336 = vmatprep.subr.bf16.mxu1 %v2641_v7 }
 0x11d   : > { %975 = vst [vmem:[#allocation2 + $0x110] sm:$0xf] %v969_v12 }
 0x11f   : > { %v988_v13 = vpop.permute.xlu1 %987  ;;  %v986_v15 = vpop.permute.xlu0 %985 }
 0x120   : > { %v993_v16 = vsel %vm991_vm12, %v986_v15, %v988_v13  ;;  %v1059_v26 = vld [vmem:[#allocation2 + $0xf8] sm:$0xff] }
 0x121   : > { %999 = vst [vmem:[#allocation2 + $0x110] sm:$0xf0] %v993_v16 }
 0x123   : > { %v936_v17 = vpop.permute.xlu1 %935  ;;  %v912_v18 = vpop.permute.xlu0 %911 }
 0x124   : > { %v944_v19 = vsel %vm943_vm9, %v936_v17, %v938_v5  ;;  %v920_v20 = vsel %vm919_vm7, %v912_v18, %v914_v62  ;;  %v1027_v62 = vld [vmem:[%s3410_s1 + $0x10] sm:$0xf] }
 0x125   : > { %950 = vst [vmem:[#allocation2 + $0xf0] sm:$0xf0] %v944_v19  ;;  %926 = vst [vmem:[#allocation2 + $0xf0] sm:$0xf] %v920_v20 }
 0x127   : > { %v984_v22 = vpop.permute.xlu1 %983  ;;  %v960_v23 = vpop.permute.xlu0 %959 }
 0x128   : > { %v992_v24 = vsel %vm991_vm12, %v984_v22, %v986_v15  ;;  %v968_v25 = vsel %vm967_vm10, %v960_v23, %v962_v4  ;;  %v1062_v27 = vld [vmem:[#allocation2 + $0x110] sm:$0xff] }
 0x129   : > { %998 = vst [vmem:[#allocation2 + $0x108] sm:$0xf0] %v992_v24  ;;  %974 = vst [vmem:[#allocation2 + $0x108] sm:$0xf] %v968_v25  ;;  %v2320_v29 = vpack.c.bf16 %v1062_v27, %v1059_v26 }
 0x12b   : > { %v846_v58 = vpop.permute.xlu1 %845  ;;  %v822_v14 = vpop.permute.xlu0 %821  ;;  %2321 = vmatprep.subr.bf16.mxu0 %v2320_v29 }
 0x12c   : > { %v850_v11 = vsel %vm847_vm1, %v3088_v30, %v846_v58  ;;  %v826_v32 = vsel %vm823_vm0, %v3084_v3, %v822_v14  ;;  %v1058_v31 = vld [vmem:[#allocation2 + $0xf0] sm:$0xff] }
 0x12d   : > { %856 = vst [vmem:[#allocation2 + $0xd0] sm:$0xf0] %v850_v11  ;;  %832 = vst [vmem:[#allocation2 + $0xd0] sm:$0xf] %v826_v32 }
 0x12f   : > { %v894_v33 = vpop.permute.xlu1 %893  ;;  %v870_v34 = vpop.permute.xlu0 %869 }
 0x130   : > { %v898_v2 = vsel %vm895_vm6, %v3097_v36, %v894_v33  ;;  %v874_v35 = vsel %vm871_vm3, %v3092_v0, %v870_v34  ;;  %v1061_v28 = vld [vmem:[#allocation2 + $0x108] sm:$0xff]  ;;  %vm2010_vm6 = vcmask 130048  }
 0x131   : > { %904 = vst [vmem:[#allocation2 + $0xe8] sm:$0xf0] %v898_v2  ;;  %880 = vst [vmem:[#allocation2 + $0xe8] sm:$0xf] %v874_v35  ;;  %v2322_v6 = vpack.c.bf16 %v1061_v28, %v1058_v31 }
 0x133   : > { %v942_v1 = vpop.permute.xlu1 %941  ;;  %v918_v30 = vpop.permute.xlu0 %917  ;;  %2323 = vmatpush1.bf16.msra.mxu0 %v2322_v6 }
 0x134   : > { %v946_v3 = vsel %vm943_vm9, %v940_v63, %v942_v1  ;;  %v922_v38 = vsel %vm919_vm7, %v916_v46, %v918_v30  ;;  %v1054_v42 = vld [vmem:[#allocation2 + $0xd0] sm:$0xff]  ;;  %v1026_v46 = vld [vmem:[%s3410_s1 + $0x8] sm:$0xff]  ;;  %vm1562_vm7 = vcmask 203776   ;;  %vm1613_vm9 = vcmask 195584  }
 0x135   : > { %952 = vst [vmem:[#allocation2 + $0x100] sm:$0xf0] %v946_v3  ;;  %928 = vst [vmem:[#allocation2 + $0x100] sm:$0xf] %v922_v38 }
 0x137   : > { %v990_v39 = vpop.permute.xlu1 %989  ;;  %v966_v41 = vpop.permute.xlu0 %965 }
 0x138   : > { %v994_v36 = vsel %vm991_vm12, %v988_v13, %v990_v39  ;;  %v970_v0 = vsel %vm967_vm10, %v964_v10, %v966_v41  ;;  %v1057_v43 = vld [vmem:[#allocation2 + $0xe8] sm:$0xff]  ;;  %vm1664_vm10 = vcmask 187392   ;;  %vm1715_vm12 = vcmask 7168  }
 0x139   : > { %1000 = vst [vmem:[#allocation2 + $0x118] sm:$0xf0] %v994_v36  ;;  %976 = vst [vmem:[#allocation2 + $0x118] sm:$0xf] %v970_v0  ;;  %v2337_v37 = vpack.c.bf16 %v1057_v43, %v1054_v42 }
 0x13b   : > { %v1012_v44 = vpop.permute.xlu1 %1011  ;;  %v1010_v45 = vpop.permute.xlu0 %1009  ;;  %2338 = vmatpush3.bf16.msra.mxu1 %v2337_v37 }
 0x13c   : > { %v1017_v47 = vsel %vm1015_vm13, %v1010_v45, %v1012_v44  ;;  %2339 = vmatprep.subr.bf16.mxu1 %v2641_v7  ;;  %v1060_v52 = vld [vmem:[#allocation2 + $0x100] sm:$0xff] }
 0x13d   : > { %1023 = vst [vmem:[#allocation2 + $0x128] sm:$0xf] %v1017_v47 }
 0x13f   : > { %v1014_v48 = vpop.permute.xlu1 %1013  ;;  %v1008_v49 = vpop.permute.xlu0 %1007 }
 0x140   : > { %v1018_v50 = vsel %vm1015_vm13, %v1012_v44, %v1014_v48  ;;  %v1016_v51 = vsel %vm1015_vm13, %v1008_v49, %v1010_v45  ;;  %v1063_v53 = vld [vmem:[#allocation2 + $0x118] sm:$0xff]  ;;  %vm1828_vm13 = vcmask 859136  }
 0x141   : > { %1024 = vst [vmem:[#allocation2 + $0x130] sm:$0xf] %v1018_v50  ;;  %1022 = vst [vmem:[#allocation2 + $0x120] sm:$0xf] %v1016_v51  ;;  %v2340_v55 = vpack.c.bf16 %v1063_v53, %v1060_v52 }
 0x143   : > { %2341 = vmatpush3.bf16.msra.mxu1 %v2340_v55 }
 0x144   : > { %v1065_v56 = vld [vmem:[#allocation2 + $0x128] sm:$0xf]  ;;  %2289 = vmatprep.subr.mxu1 %v2658_v21 }
 0x145   : > { %2235 = vmatprep.subr.msk.mxu0 %vm1076_vm14, %v1065_v56 }
 0x148   : > { %v1064_v60 = vld [vmem:[#allocation2 + $0x120] sm:$0xf]  ;;  %v1066_v61 = vld [vmem:[#allocation2 + $0x130] sm:$0xf] }
 0x149   : > { %2236 = vmatpush1.msk.msra.mxu0 %vm1076_vm14, %v1064_v60  ;;  %2290 = vmatpush3.msk.msra.mxu1 %vm1076_vm14, %v1066_v61 }
 0x14a   : > { %2237 = vmatmul.mubr.msk.f32.vlgmr.msra.gmra.mrb[0].mxu0 %vm655_vm8, %v1025_v59  ;;  %2292 = vmatmul.mubr.msk.f32.vlgmr.msra.gmra.mrb[0].mxu1 %vm655_vm8, %v1025_v59 }
 0x14b   : > { %1156 = vmatprep.mubr.f32.mxu0 %v2658_v21  ;;  %2294 = vmatprep.mubr.msk.f32.mxu1 %vm2660_vm11, %v2658_v21 }
 0x14c   : > { %2378 = vmatprep.subr.bf16.mxu1 %v2641_v7 }
 0x14e   : > { %2238 = vmatmul.mubr.msk.f32.gmra.mrb[2].mxu0 %vm655_vm8, %v1026_v46  ;;  %2295 = vmatmul.mubr.msk.f32.gmra.mrb[2].mxu1 %vm655_vm8, %v1026_v46 }
 0x14f   : > { %1162 = vmatprep.mubr.f32.mxu0 %v2658_v21  ;;  %2297 = vmatprep.mubr.msk.f32.mxu1 %vm2660_vm11, %v2658_v21 }
 0x150   : > { %v1254_v8 = vpop.permute.xlu0 %1253  ;;  %v1259_v9 = vpop.permute.xlu1 %1258 }
 0x152   : > { %2239 = vmatmul.mubr.msk.f32.gmra.mrb[4].mxu0 %vm655_vm8, %v1027_v62  ;;  %2298 = vmatmul.mubr.msk.f32.gmra.mrb[4].mxu1 %vm655_vm8, %v1027_v62 }
 0x21d   : > { %v1235_v40 = vpop.f32.mrb[0].mxu1  ;;  %v1152_v63 = vpop.f32.mrb[0].mxu0 }
 0x21e   : > { %v2293_v5 = vpop.f32.mrb[1].mxu1  ;;  %v1154_v57 = vpop.f32.mrb[1].mxu0  ;;  %v1261_v54 = vadd.f32 %v1254_v8, %v1152_v63  ;;  %v1263_v13 = vadd.f32 %v1254_v8, %v1235_v40 }
 0x21f   : > { %v1262_v10 = vadd.f32 %v1254_v8, %v1154_v57 }
 0x221   : > { %v1158_v4 = vpop.f32.mrb[2].mxu0  ;;  %v1240_v12 = vpop.f32.mrb[2].mxu1 }
 0x222   : > { %v1264_v15 = vadd.f32 %v1259_v9, %v1158_v4  ;;  %v1266_v16 = vadd.f32 %v1259_v9, %v1240_v12  ;;  %v1160_v17 = vpop.f32.mrb[3].mxu0  ;;  %v2296_v18 = vpop.f32.mrb[3].mxu1 }
 0x223   : > { %v1265_v19 = vadd.f32 %v1259_v9, %v1160_v17 }
 0x224   : > { %v1362_v20 = vadd.f32 %v1264_v15, %v1261_v54  ;;  %v1376_v22 = vadd.f32 %v1266_v16, %v1263_v13 }
 0x225   : > { %v1369_v23 = vadd.f32 %v1265_v19, %v1262_v10 }
 0x226   : > { %v1363_v24 = vrot.slane %v1362_v20, 4  ;;  %v1377_v25 = vrot.slane %v1376_v22, 4 }
 0x227   : > { %v1370_v26 = vrot.slane %v1369_v23, 4 }
 0x228   : > { %v1364_v27 = vadd.f32 %v1363_v24, %v1362_v20  ;;  %v1378_v29 = vadd.f32 %v1377_v25, %v1376_v22  ;;  %v1499_v22 = vlaneseq  ;;  %v1443_v24 = vpop.permute.xlu0 %1442 }
 0x229   : > { %v1371_v58 = vadd.f32 %v1370_v26, %v1369_v23  ;;  %v1438_v23 = vpop.permute.xlu1 %1437 }
 0x22a   : > { %v1365_v14 = vrot.slane %v1364_v27, 2  ;;  %v1379_v11 = vrot.slane %v1378_v29, 2  ;;  %v1500_v25 = vshrl.u32 %v1499_v22, 7 }
 0x22b   : > { %v1372_v32 = vrot.slane %v1371_v58, 2 }
 0x22c   : > { %v1366_v33 = vadd.f32 %v1365_v14, %v1364_v27  ;;  %v1380_v34 = vadd.f32 %v1379_v11, %v1378_v29  ;;  %v1459_v29 = vpop.permute.xlu0 %1458 }
 0x22d   : > { %v1373_v2 = vadd.f32 %v1372_v32, %v1371_v58  ;;  %v1454_v27 = vpop.permute.xlu1 %1453  ;;  %v1501_v58 = vsub.s32 0, %v1500_v25 }
 0x22e   : > { %v1367_v35 = vrot.slane %v1366_v33, 1  ;;  %v1381_v31 = vrot.slane %v1380_v34, 1 }
 0x22f   : > { %v1374_v28 = vrot.slane %v1373_v2, 1 }
 0x230   : > { %v1368_v6 = vadd.f32 %v1367_v35, %v1366_v33  ;;  %v1382_v1 = vadd.f32 %v1381_v31, %v1380_v34  ;;  %v1497_v33 = vld [vmem:[%s3412_s3] sm:$0x7]  ;;  %v1509_v31 = vsub.s32 2, %v1500_v25 }
 0x231   : > { %v1375_v30 = vadd.f32 %v1374_v28, %v1373_v2  ;;  %v1505_v28 = vsub.s32 1, %v1500_v25  ;;  %v1267_v25 = vld [vmem:[%s3415_s6] sm:$0xf] }
 0x232   : > { %v1384_v3 = vmul.f32 0.0625, %v1368_v6  ;;  %v1386_v38 = vmul.f32 0.0625, %v1382_v1 }
 0x233   : > { %v1385_v39 = vmul.f32 0.0625, %v1375_v30 }
 0x234   : > { %v1387_v41 = vsub.f32 %v1261_v54, %v1384_v3  ;;  %v1390_v36 = vsub.f32 %v1264_v15, %v1384_v3  ;;  %v1389_v0 = vsub.f32 %v1263_v13, %v1386_v38  ;;  %v1392_v42 = vsub.f32 %v1266_v16, %v1386_v38 }
 0x235   : > { %v1388_v43 = vsub.f32 %v1262_v10, %v1385_v39  ;;  %v1391_v37 = vsub.f32 %v1265_v19, %v1385_v39  ;;  %v1502_v38 = vrot.slane %v1497_v33, %v1501_v58 }
 0x236   : > { %v1393_v44 = vmul.f32 %v1387_v41, %v1387_v41  ;;  %v1396_v45 = vmul.f32 %v1390_v36, %v1390_v36  ;;  %v1395_v47 = vmul.f32 %v1389_v0, %v1389_v0  ;;  %v1398_v48 = vmul.f32 %v1392_v42, %v1392_v42 }
 0x237   : > { %v1394_v49 = vmul.f32 %v1388_v43, %v1388_v43  ;;  %v1397_v50 = vmul.f32 %v1391_v37, %v1391_v37 }
 0x238   : > { %v1399_v51 = vadd.f32 %v1396_v45, %v1393_v44  ;;  %v1413_v52 = vadd.f32 %v1398_v48, %v1395_v47  ;;  %v1478_v48 = vpop.permute.xlu1 %1477 }
 0x239   : > { %v1406_v53 = vadd.f32 %v1397_v50, %v1394_v49  ;;  %v1483_v49 = vpop.permute.xlu0 %1482 }
 0x23a   : > { %v1400_v55 = vrot.slane %v1399_v51, 4  ;;  %v1414_v56 = vrot.slane %v1413_v52, 4 }
 0x23b   : > { %v1407_v59 = vrot.slane %v1406_v53, 4 }
 0x23c   : > { %v1401_v60 = vadd.f32 %v1400_v55, %v1399_v51  ;;  %v1415_v61 = vadd.f32 %v1414_v56, %v1413_v52  ;;  %v1510_v52 = vrot.slane %v1497_v33, %v1509_v31 }
 0x23d   : > { %v1408_v46 = vadd.f32 %v1407_v59, %v1406_v53 }
 0x23e   : > { %v1402_v62 = vrot.slane %v1401_v60, 2  ;;  %v1416_v40 = vrot.slane %v1415_v61, 2 }
 0x23f   : > { %v1409_v63 = vrot.slane %v1408_v46, 2 }
 0x240   : > { %v1403_v5 = vadd.f32 %v1402_v62, %v1401_v60  ;;  %v1417_v57 = vadd.f32 %v1416_v40, %v1415_v61 }
 0x241   : > { %v1410_v8 = vadd.f32 %v1409_v63, %v1408_v46 }
 0x242   : > { %v1404_v9 = vrot.slane %v1403_v5, 1  ;;  %v1418_v54 = vrot.slane %v1417_v57, 1 }
 0x243   : > { %v1411_v10 = vrot.slane %v1410_v8, 1 }
 0x244   : > { %v1405_v4 = vadd.f32 %v1404_v9, %v1403_v5  ;;  %v1419_v12 = vadd.f32 %v1418_v54, %v1417_v57 }
 0x245   : > { %v1412_v13 = vadd.f32 %v1411_v10, %v1410_v8 }
 0x246   : > { %v1420_v15 = vmul.f32 0.0625, %v1405_v4  ;;  %v1422_v16 = vmul.f32 0.0625, %v1419_v12 }
 0x247   : > { %v1421_v17 = vmul.f32 0.0625, %v1412_v13 }
 0x248   : > { %v1423_v18 = vadd.f32 1e-05, %v1420_v15  ;;  %v1425_v19 = vadd.f32 1e-05, %v1422_v16 }
 0x249   : > { %v1424_v20 = vadd.f32 1e-05, %v1421_v17 }
 0x24a   : > { %2614 = vrsqrt.f32 %v1423_v18 }
 0x24b   : > { %2616 = vrsqrt.f32 %v1425_v19 }
 0x24c   : > { %2618 = vrsqrt.f32 %v1424_v20 }
 0x254   : > { %v2615_v26 = vpop.eup %2614 }
 0x255   : > { %v2617_v14 = vpop.eup %2616  ;;  %v1429_v11 = vmul.f32 %v2615_v26, %v1387_v41  ;;  %v1432_v32 = vmul.f32 %v2615_v26, %v1390_v36  ;;  %v1277_v26 = vld [vmem:[%s3418_s9] sm:$0xf] }
 0x256   : > { %v2619_v34 = vpop.eup %2618  ;;  %v1431_v2 = vmul.f32 %v2617_v14, %v1389_v0  ;;  %v1434_v35 = vmul.f32 %v2617_v14, %v1392_v42  ;;  %v1506_v0 = vrot.slane %v1497_v33, %v1505_v28  ;;  %v2157_v14 = vld [vmem:[%s3421_s12] sm:$0xf] }
 0x257   : > { %v1445_v6 = vmul.f32 %v1438_v23, %v1429_v11  ;;  %v1448_v1 = vmul.f32 %v1443_v24, %v1432_v32  ;;  %v1430_v30 = vmul.f32 %v2619_v34, %v1388_v43  ;;  %v1433_v3 = vmul.f32 %v2619_v34, %v1391_v37  ;;  %v1276_v11 = vld [vmem:[%s3417_s8] sm:$0xf]  ;;  %v2451_v34 = vpop.permute.xlu1 %2450 }
 0x258   : > { %v1447_v39 = vmul.f32 %v1438_v23, %v1431_v2  ;;  %v1450_v44 = vmul.f32 %v1443_v24, %v1434_v35  ;;  %v2002_v33 = vld [vmem:[%s3414_s5] sm:$0xf]  ;;  %v3264_v35 = vpop.permute.xlu0 %2470 }
 0x259   : > { %v1461_v45 = vadd.f32 %v1454_v27, %v1445_v6  ;;  %v1464_v47 = vadd.f32 %v1459_v29, %v1448_v1  ;;  %v1446_v41 = vmul.f32 %v1438_v23, %v1430_v30  ;;  %v1449_v36 = vmul.f32 %v1443_v24, %v1433_v3  ;;  %v3232_v23 = vld [vmem:[%s3411_s2] sm:$0xff] }
 0x25a   : > { %v1463_v50 = vadd.f32 %v1454_v27, %v1447_v39  ;;  %v1466_v51 = vadd.f32 %v1459_v29, %v1450_v44  ;;  %v2009_v24 = vcombine.high %v3232_v23, %v3232_v23 }
 0x25b   : > { %vm1469_vm8 = vcmp.gt.f32.partialorder %v1461_v45, 0.0  ;;  %vm1472_vm11 = vcmp.gt.f32.partialorder %v1464_v47, 0.0  ;;  %v1485_v42 = vmul.f32 %v1478_v48, %v1461_v45  ;;  %v1488_v53 = vmul.f32 %v1483_v49, %v1464_v47  ;;  %v2456_v2 = vpop.permute.xlu1 %2455 }
 0x25c   : > { %vm1471_vm15 = vcmp.gt.f32.partialorder %v1463_v50, 0.0  ;;  %vm1474_vm0 = vcmp.gt.f32.partialorder %v1466_v51, 0.0  ;;  %v1487_v43 = vmul.f32 %v1478_v48, %v1463_v50  ;;  %v1490_v37 = vmul.f32 %v1483_v49, %v1466_v51  ;;  %2244 = vmatprep.mubr.msk.f32.mxu0 %vm2010_vm6, %v2009_v24  ;;  %2245 = vmatprep.mubr.msk.f32.mxu1 %vm2010_vm6, %v2009_v24  ;;  %v3268_v28 = vpop.permute.xlu0 %2475 }
 0x25d   : > { %v1491_v55 = vsel %vm1469_vm8, %v1461_v45, %v1485_v42  ;;  %v1494_v56 = vsel %vm1472_vm11, %v1464_v47, %v1488_v53  ;;  %v1462_v59 = vadd.f32 %v1454_v27, %v1446_v41  ;;  %v1465_v60 = vadd.f32 %v1459_v29, %v1449_v36  ;;  %v3245_v27 = vpop.f32.mrb[4].mxu0  ;;  %v3247_v29 = vpop.f32.mrb[4].mxu1 }
 0x25e   : > { %v3176_v61 = vmul.f32 %v1502_v38, %v1491_v55  ;;  %v3178_v46 = vmul.f32 %v1502_v38, %v1494_v56  ;;  %v1493_v62 = vsel %vm1471_vm15, %v1463_v50, %v1487_v43  ;;  %v1496_v40 = vsel %vm1474_vm0, %v1466_v51, %v1490_v37  ;;  %v2299_v58 = vpop.f32.mrb[5].mxu1  ;;  %v3257_v32 = vpop.f32.mrb[5].mxu0 }
 0x25f   : > { %v3180_v63 = vmul.f32 %v1510_v52, %v1493_v62  ;;  %v3182_v5 = vmul.f32 %v1510_v52, %v1496_v40  ;;  %vm1470_vm1 = vcmp.gt.f32.partialorder %v1462_v59, 0.0  ;;  %vm1473_vm3 = vcmp.gt.f32.partialorder %v1465_v60, 0.0 }
 0x260   : > { %v1486_v57 = vmul.f32 %v1478_v48, %v1462_v59  ;;  %v1489_v8 = vmul.f32 %v1483_v49, %v1465_v60  ;;  %v2499_v9 = vpack.i.bf16 %v3178_v46, %v3176_v61  ;;  %v2360_v16 = vpack.c.bf16 %v3178_v46, %v3176_v61 }
 0x261   : > { %v2479_v54 = vpack.i.bf16 %v3182_v5, %v3180_v63  ;;  %v2391_v15 = vpack.c.bf16 %v3182_v5, %v3180_v63  ;;  %v2453_v47 = vunpack.i.h.bf16 %v2451_v34  ;;  %v2452_v41 = vunpack.i.l.bf16 %v2451_v34 }
 0x262   : > { %v1492_v10 = vsel %vm1470_vm1, %v1462_v59, %v1486_v57  ;;  %v1495_v4 = vsel %vm1473_vm3, %v1465_v60, %v1489_v8  ;;  %2500 = vrot.lane.b32.xlu1 %v2499_v9, %s2635_s15  ;;  %v2458_v48 = vunpack.i.h.bf16 %v2456_v2  ;;  %v2457_v49 = vunpack.i.l.bf16 %v2456_v2 }
 0x263   : > { %v3189_v12 = vmul.f32 %v1506_v0, %v1492_v10  ;;  %v3191_v13 = vmul.f32 %v1506_v0, %v1495_v4  ;;  %2480 = vrot.lane.b32.xlu0 %v2479_v54, %s2662_s24 }
 0x265   : > { %v2509_v17 = vpack.i.bf16 %v3189_v12, %v3176_v61  ;;  %v2514_v18 = vpack.i.bf16 %v3191_v13, %v3178_v46  ;;  %v2559_v19 = vpack.i.bf16 %v3180_v63, %v3189_v12  ;;  %v2564_v20 = vpack.i.bf16 %v3182_v5, %v3191_v13 }
 0x266   : > { %2505 = vrot.lane.b32.xlu1 %v2499_v9, %s2666_s30  ;;  %v2358_v22 = vpack.c.bf16 %v3191_v13, %v3189_v12 }
 0x267   : > { %2485 = vrot.lane.b32.xlu0 %v2479_v54, %s2663_s27 }
 0x26a   : > { %2510 = vrot.lane.b32.xlu1 %v2509_v17, %s2662_s24 }
 0x26b   : > { %2490 = vrot.lane.b32.xlu0 %v2479_v54, %s2664_s28 }
 0x26e   : > { %2520 = vrot.lane.b32.xlu1 %v2509_v17, %s2663_s27 }
 0x26f   : > { %2495 = vrot.lane.b32.xlu0 %v2479_v54, %s2665_s29 }
 0x272   : > { %2530 = vrot.lane.b32.xlu1 %v2509_v17, %s2664_s28 }
 0x273   : > { %2515 = vrot.lane.b32.xlu0 %v2514_v18, %s2662_s24 }
 0x276   : > { %2540 = vrot.lane.b32.xlu1 %v2509_v17, %s2665_s29 }
 0x277   : > { %2525 = vrot.lane.b32.xlu0 %v2514_v18, %s2663_s27 }
 0x27a   : > { %2545 = vrot.lane.b32.xlu1 %v2499_v9, %s2638_s18 }
 0x27b   : > { %2535 = vrot.lane.b32.xlu0 %v2514_v18, %s2664_s28 }
 0x27e   : > { %2560 = vrot.lane.b32.xlu1 %v2559_v19, %s2635_s15 }
 0x27f   : > { %2550 = vrot.lane.b32.xlu0 %v2514_v18, %s2665_s29 }
 0x282   : > { %2570 = vrot.lane.b32.xlu1 %v2559_v19, %s2666_s30 }
 0x283   : > { %2555 = vrot.lane.b32.xlu0 %v2658_v21, %s2638_s18 }
 0x286   : > { %2580 = vrot.lane.b32.xlu1 %v2559_v19, %s2638_s18 }
 0x287   : > { %2565 = vrot.lane.b32.xlu0 %v2564_v20, %s2635_s15 }
 0x28a   : > { %2590 = vrot.lane.b32.xlu1 %v2559_v19, %s2639_s19 }
 0x28b   : > { %2575 = vrot.lane.b32.xlu0 %v2564_v20, %s2666_s30 }
 0x28e   : > { %2595 = vrot.lane.b32.xlu1 %v2499_v9, %s2639_s19 }
 0x28f   : > { %2585 = vrot.lane.b32.xlu0 %v2564_v20, %s2638_s18 }
 0x292   : > { %1270 = vperm.xlu1 %2448, %v1267_v25  }
 0x293   : > { %2600 = vrot.lane.b32.xlu0 %v2564_v20, %s2639_s19 }
 0x296   : > { %1352 = vperm.xlu1 %2448, %v1277_v26  }
 0x297   : > { %2605 = vrot.lane.b32.xlu0 %v2658_v21, %s2639_s19  ;;  %v3262_v21 = vpop.permute.xlu1 %2460  ;;  %s2405_s19 = smul.u32 12, %s3424_s26 }
 0x298   : > { %v2463_v52 = vunpack.i.h.bf16 %v3262_v21  ;;  %v2462_v0 = vunpack.i.l.bf16 %v3262_v21 }
 0x299   : > { %s440_s17 = scalar_lea.vmem %s3422_s13, %s2405_s19 }
 0x29a   : > { %2160 = vperm.xlu1 %2448, %v2157_v14  }
 0x29b   : > { %1344 = vperm.xlu0 %2447, %v1276_v11   ;;  %v3266_v31 = vpop.permute.xlu1 %2465 }
 0x29c   : > { %v2468_v42 = vunpack.i.h.bf16 %v3266_v31  ;;  %v2467_v37 = vunpack.i.l.bf16 %v3266_v31  ;;  %v2473_v31 = vunpack.i.h.bf16 %v3264_v35 }
 0x29f   : > { %2005 = vperm.xlu0 %2447, %v2002_v33  }
 0x2d4   : > { %v3270_v6 = vpop.permute.xlu1 %2500 }
 0x2d5   : > { %v2481_v1 = vpop.permute.xlu0 %2480 }
 0x2d6   : > { %v2482_v53 = vunpack.i.l.bf16 %v2481_v1  ;;  %v2483_v55 = vunpack.i.h.bf16 %v2481_v1 }
 0x2d8   : > { %v3272_v30 = vpop.permute.xlu1 %2505 }
 0x2d9   : > { %v2486_v3 = vpop.permute.xlu0 %2485 }
 0x2da   : > { %v2487_v4 = vunpack.i.l.bf16 %v2486_v3  ;;  %v2488_v24 = vunpack.i.h.bf16 %v2486_v3 }
 0x2dc   : > { %v2511_v38 = vpop.permute.xlu1 %2510 }
 0x2dd   : > { %v3274_v39 = vpop.permute.xlu0 %2490  ;;  %v2513_v36 = vunpack.i.h.bf16 %v2511_v38  ;;  %v2512_v50 = vunpack.i.l.bf16 %v2511_v38 }
 0x2de   : > { %v2492_v38 = vunpack.i.l.bf16 %v3274_v39 }
 0x2df   : > { %v1565_v60 = vsel %vm1562_vm7, %v2513_v36, %v2482_v53  ;;  %v1563_v57 = vsel %vm1562_vm7, %v2452_v41, %v2512_v50  ;;  %v1564_v20 = vsel %vm1562_vm7, %v2512_v50, %v2513_v36 }
 0x2e0   : > { %v2521_v44 = vpop.permute.xlu1 %2520 }
 0x2e1   : > { %v3276_v45 = vpop.permute.xlu0 %2495  ;;  %v2523_v62 = vunpack.i.h.bf16 %v2521_v44  ;;  %v2522_v40 = vunpack.i.l.bf16 %v2521_v44 }
 0x2e3   : > { %v1616_v14 = vsel %vm1613_vm9, %v2523_v62, %v2487_v4  ;;  %v1614_v11 = vsel %vm1613_vm9, %v2457_v49, %v2522_v40  ;;  %v1615_v36 = vsel %vm1613_vm9, %v2522_v40, %v2523_v62  ;;  %v2493_v49 = vunpack.i.h.bf16 %v3274_v39 }
 0x2e4   : > { %v3278_v51 = vpop.permute.xlu1 %2530  ;;  %v2497_v40 = vunpack.i.l.bf16 %v3276_v45 }
 0x2e5   : > { %v2516_v43 = vpop.permute.xlu0 %2515  ;;  %v2533_v33 = vunpack.i.h.bf16 %v3278_v51  ;;  %v2532_v34 = vunpack.i.l.bf16 %v3278_v51 }
 0x2e6   : > { %v2518_v56 = vunpack.i.h.bf16 %v2516_v43  ;;  %v2517_v59 = vunpack.i.l.bf16 %v2516_v43 }
 0x2e7   : > { %v1667_v53 = vsel %vm1664_vm10, %v2533_v33, %v2492_v38  ;;  %v1665_v43 = vsel %vm1664_vm10, %v2462_v0, %v2532_v34 }
 0x2e8   : > { %v1568_v8 = vsel %vm1562_vm7, %v2518_v56, %v2483_v55  ;;  %v1566_v9 = vsel %vm1562_vm7, %v2453_v47, %v2517_v59  ;;  %v3288_v54 = vpop.permute.xlu1 %2540  ;;  %v1567_v10 = vsel %vm1562_vm7, %v2517_v59, %v2518_v56 }
 0x2e9   : > { %v2344_v17 = vpack.c.bf16 %v1566_v9, %v1563_v57  ;;  %v2379_v18 = vpack.c.bf16 %v1568_v8, %v1565_v60  ;;  %v2526_v19 = vpop.permute.xlu0 %2525  ;;  %v2342_v58 = vpack.c.bf16 %v1567_v10, %v1564_v20  ;;  %v2543_v55 = vunpack.i.h.bf16 %v3288_v54 }
 0x2ea   : > { %v2528_v25 = vunpack.i.h.bf16 %v2526_v19  ;;  %v2527_v26 = vunpack.i.l.bf16 %v2526_v19  ;;  %v2542_v56 = vunpack.i.l.bf16 %v3288_v54  ;;  %v1666_v9 = vsel %vm1664_vm10, %v2532_v34, %v2533_v33 }
 0x2eb   : > { %2380 = vmatpush1.bf16.msra.mxu1 %v2379_v18  ;;  %2343 = vmatprep.subr.bf16.mxu0 %v2342_v58  ;;  %v2498_v54 = vunpack.i.h.bf16 %v3276_v45 }
 0x2ec   : > { %v1619_v2 = vsel %vm1613_vm9, %v2528_v25, %v2488_v24  ;;  %v1617_v21 = vsel %vm1613_vm9, %v2458_v48, %v2527_v26  ;;  %v3298_v1 = vpop.permute.xlu1 %2545  ;;  %2381 = vmatprep.subr.bf16.mxu1 %v2641_v7  ;;  %v1618_v3 = vsel %vm1613_vm9, %v2527_v26, %v2528_v25  ;;  %2345 = vmatpush1.bf16.msra.mxu0 %v2344_v17 }
 0x2ed   : > { %v2348_v44 = vpack.c.bf16 %v1617_v21, %v1614_v11  ;;  %v2382_v47 = vpack.c.bf16 %v1619_v2, %v1616_v14  ;;  %v2536_v41 = vpop.permute.xlu0 %2535  ;;  %v2346_v48 = vpack.c.bf16 %v1618_v3, %v1615_v36  ;;  %v1718_v17 = vsel %vm1715_vm12, %v2543_v55, %v2497_v40 }
 0x2ee   : > { %v2538_v50 = vunpack.i.h.bf16 %v2536_v41  ;;  %v2537_v51 = vunpack.i.l.bf16 %v2536_v41  ;;  %v1716_v18 = vsel %vm1715_vm12, %v2467_v37, %v2542_v56  ;;  %v1717_v37 = vsel %vm1715_vm12, %v2542_v56, %v2543_v55 }
 0x2ef   : > { %2383 = vmatpush1.bf16.msra.mxu1 %v2382_v47  ;;  %2347 = vmatprep.subr.bf16.mxu0 %v2346_v48  ;;  %v2478_v2 = vunpack.i.h.bf16 %v3268_v28  ;;  %v2477_v21 = vunpack.i.l.bf16 %v3268_v28  ;;  %v2503_v3 = vunpack.i.h.bf16 %v3270_v6  ;;  %v2508_v47 = vunpack.i.h.bf16 %v3272_v30 }
 0x2f0   : > { %v1670_v59 = vsel %vm1664_vm10, %v2538_v50, %v2493_v49  ;;  %v1668_v60 = vsel %vm1664_vm10, %v2463_v52, %v2537_v51  ;;  %v3311_v62 = vpop.permute.xlu1 %2560  ;;  %2384 = vmatprep.subr.bf16.mxu1 %v2641_v7  ;;  %v1669_v39 = vsel %vm1664_vm10, %v2537_v51, %v2538_v50  ;;  %2349 = vmatpush1.bf16.msra.mxu0 %v2348_v44  ;;  %v2502_v44 = vunpack.i.l.bf16 %v3270_v6 }
 0x2f1   : > { %v2352_v0 = vpack.c.bf16 %v1668_v60, %v1665_v43  ;;  %v2385_v57 = vpack.c.bf16 %v1670_v59, %v1667_v53  ;;  %v2551_v8 = vpop.permute.xlu0 %2550  ;;  %v2350_v52 = vpack.c.bf16 %v1669_v39, %v1666_v9  ;;  %v2563_v11 = vunpack.i.h.bf16 %v3311_v62 }
 0x2f2   : > { %v2553_v10 = vunpack.i.h.bf16 %v2551_v8  ;;  %v2552_v4 = vunpack.i.l.bf16 %v2551_v8  ;;  %v2562_v33 = vunpack.i.l.bf16 %v3311_v62  ;;  %v2507_v36 = vunpack.i.l.bf16 %v3272_v30 }
 0x2f3   : > { %2386 = vmatpush1.bf16.msra.mxu1 %v2385_v57  ;;  %2351 = vmatprep.subr.bf16.mxu0 %v2350_v52  ;;  %v2547_v59 = vunpack.i.l.bf16 %v3298_v1 }
 0x2f4   : > { %v1721_v19 = vsel %vm1715_vm12, %v2553_v10, %v2498_v54  ;;  %v1719_v20 = vsel %vm1715_vm12, %v2468_v42, %v2552_v4  ;;  %v3326_v24 = vpop.permute.xlu1 %2570  ;;  %2387 = vmatprep.subr.bf16.mxu1 %v2641_v7  ;;  %v1720_v45 = vsel %vm1715_vm12, %v2552_v4, %v2553_v10  ;;  %2353 = vmatpush1.bf16.msra.mxu0 %v2352_v0  ;;  %v2472_v42 = vunpack.i.l.bf16 %v3264_v35 }
 0x2f5   : > { %v2356_v25 = vpack.c.bf16 %v1719_v20, %v1716_v18  ;;  %v2388_v26 = vpack.c.bf16 %v1721_v19, %v1718_v17  ;;  %v3330_v58 = vpop.permute.xlu0 %2555  ;;  %v2354_v14 = vpack.c.bf16 %v1720_v45, %v1717_v37  ;;  %v2573_v28 = vunpack.i.h.bf16 %v3326_v24 }
 0x2f6   : > { %v1780_v49 = vsel %vm463_vm2, %v2563_v11, %v2472_v42  ;;  %v2572_v50 = vunpack.i.l.bf16 %v3326_v24  ;;  %v1778_v6 = vsel %vm463_vm2, %v2502_v44, %v2562_v33  ;;  %v1779_v5 = vsel %vm463_vm2, %v2562_v33, %v2563_v11 }
 0x2f7   : > { %2389 = vmatpush1.bf16.msra.mxu1 %v2388_v26  ;;  %2355 = vmatprep.subr.bf16.mxu0 %v2354_v14  ;;  %v1831_v60 = vsel %vm1828_vm13, %v2573_v28, %v2477_v21  ;;  %v2557_v40 = vunpack.i.l.bf16 %v3330_v58  ;;  %v2558_v0 = vunpack.i.h.bf16 %v3330_v58 }
 0x2f8   : > { %v2581_v34 = vpop.permute.xlu1 %2580  ;;  %2390 = vmatprep.subr.bf16.mxu1 %v2641_v7  ;;  %2357 = vmatpush1.bf16.msra.mxu0 %v2356_v25  ;;  %v1829_v62 = vsel %vm1828_vm13, %v2507_v36, %v2572_v50  ;;  %v1830_v54 = vsel %vm1828_vm13, %v2572_v50, %v2573_v28 }
 0x2f9   : > { %v2566_v38 = vpop.permute.xlu0 %2565  ;;  %2359 = vmatprep.subr.bf16.mxu0 %v2358_v22  ;;  %v2548_v22 = vunpack.i.h.bf16 %v3298_v1  ;;  %v2582_v39 = vunpack.i.l.bf16 %v2581_v34 }
 0x2fa   : > { %v2568_v35 = vunpack.i.h.bf16 %v2566_v38  ;;  %v2567_v41 = vunpack.i.l.bf16 %v2566_v38 }
 0x2fb   : > { %2392 = vmatpush1.bf16.msra.mxu1 %v2391_v15  ;;  %v2583_v15 = vunpack.i.h.bf16 %v2581_v34  ;;  %v1879_v18 = vsel %vm559_vm4, %v2547_v59, %v2582_v39 }
 0x2fc   : > { %v1783_v51 = vsel %vm463_vm2, %v2568_v35, %v2473_v31  ;;  %v1781_v48 = vsel %vm463_vm2, %v2503_v3, %v2567_v41  ;;  %v3356_v12 = vpop.permute.xlu1 %2590  ;;  %2393 = vmatprep.subr.bf16.mxu1 %v2641_v7  ;;  %v1782_v13 = vsel %vm463_vm2, %v2567_v41, %v2568_v35  ;;  %2361 = vmatpush1.bf16.msra.mxu0 %v2360_v16 }
 0x2fd   : > { %v2364_v30 = vpack.c.bf16 %v1781_v48, %v1778_v6  ;;  %v2394_v53 = vpack.c.bf16 %v1783_v51, %v1780_v49  ;;  %v2576_v63 = vpop.permute.xlu0 %2575  ;;  %v2362_v56 = vpack.c.bf16 %v1782_v13, %v1779_v5  ;;  %v1881_v10 = vsel %vm559_vm4, %v2583_v15, %v2557_v40 }
 0x2fe   : > { %v2578_v43 = vunpack.i.h.bf16 %v2576_v63  ;;  %v2577_v55 = vunpack.i.l.bf16 %v2576_v63  ;;  %v2593_v19 = vunpack.i.h.bf16 %v3356_v12  ;;  %v2592_v20 = vunpack.i.l.bf16 %v3356_v12 }
 0x2ff   : > { %2395 = vmatpush1.bf16.msra.mxu1 %v2394_v53  ;;  %2363 = vmatprep.subr.bf16.mxu0 %v2362_v56  ;;  %v1880_v24 = vsel %vm559_vm4, %v2582_v39, %v2583_v15 }
 0x300   : > { %v1834_v61 = vsel %vm1828_vm13, %v2578_v43, %v2478_v2  ;;  %v1832_v46 = vsel %vm1828_vm13, %v2508_v47, %v2577_v55  ;;  %2396 = vmatprep.subr.bf16.mxu1 %v2641_v7  ;;  %v1833_v16 = vsel %vm1828_vm13, %v2577_v55, %v2578_v43  ;;  %2365 = vmatpush1.bf16.msra.mxu0 %v2364_v30  ;;  %v2596_v9 = vpop.permute.xlu1 %2595 }
 0x301   : > { %v2368_v1 = vpack.c.bf16 %v1832_v46, %v1829_v62  ;;  %v2397_v57 = vpack.c.bf16 %v1834_v61, %v1831_v60  ;;  %v2586_v8 = vpop.permute.xlu0 %2585  ;;  %v2366_v17 = vpack.c.bf16 %v1833_v16, %v1830_v54  ;;  %v2597_v26 = vunpack.i.l.bf16 %v2596_v9 }
 0x302   : > { %v2588_v4 = vunpack.i.h.bf16 %v2586_v8  ;;  %v2587_v52 = vunpack.i.l.bf16 %v2586_v8  ;;  %v2598_v42 = vunpack.i.h.bf16 %v2596_v9  ;;  %v1930_v3 = vsel %vm583_vm5, %v2592_v20, %v2593_v19 }
 0x303   : > { %2398 = vmatpush1.bf16.msra.mxu1 %v2397_v57  ;;  %2367 = vmatprep.subr.bf16.mxu0 %v2366_v17  ;;  %v1929_v2 = vsel %vm583_vm5, %v2597_v26, %v2592_v20 }
 0x304   : > { %v1882_v45 = vsel %vm559_vm4, %v2548_v22, %v2587_v52  ;;  %v1884_v25 = vsel %vm559_vm4, %v2588_v4, %v2558_v0  ;;  %2399 = vmatprep.subr.bf16.mxu1 %v2641_v7  ;;  %v1883_v58 = vsel %vm559_vm4, %v2587_v52, %v2588_v4  ;;  %2369 = vmatpush1.bf16.msra.mxu0 %v2368_v1 }
 0x305   : > { %v2372_v37 = vpack.c.bf16 %v1882_v45, %v1879_v18  ;;  %v2400_v14 = vpack.c.bf16 %v1884_v25, %v1881_v10  ;;  %v2601_v11 = vpop.permute.xlu0 %2600  ;;  %v2370_v31 = vpack.c.bf16 %v1883_v58, %v1880_v24 }
 0x306   : > { %v2603_v33 = vunpack.i.h.bf16 %v2601_v11  ;;  %v2602_v34 = vunpack.i.l.bf16 %v2601_v11 }
 0x307   : > { %2371 = vmatprep.subr.bf16.mxu0 %v2370_v31  ;;  %2401 = vmatpush1.bf16.msra.mxu1 %v2400_v14 }
 0x308   : > { %v1932_v21 = vsel %vm583_vm5, %v2598_v42, %v2602_v34  ;;  %v1933_v38 = vsel %vm583_vm5, %v2602_v34, %v2603_v33  ;;  %2402 = vmatprep.subr.bf16.mxu1 %v2641_v7  ;;  %2373 = vmatpush1.bf16.msra.mxu0 %v2372_v37 }
 0x309   : > { %v2376_v44 = vpack.c.bf16 %v1932_v21, %v1929_v2  ;;  %v2606_v47 = vpop.permute.xlu0 %2605  ;;  %v2374_v35 = vpack.c.bf16 %v1933_v38, %v1930_v3 }
 0x30a   : > { %v2608_v41 = vunpack.i.h.bf16 %v2606_v47  ;;  %v2607_v36 = vunpack.i.l.bf16 %v2606_v47 }
 0x30b   : > { %2375 = vmatprep.subr.bf16.mxu0 %v2374_v35 }
 0x30c   : > { %v1931_v49 = vsel %vm583_vm5, %v2593_v19, %v2607_v36  ;;  %v1934_v28 = vsel %vm583_vm5, %v2603_v33, %v2608_v41  ;;  %2377 = vmatpush1.bf16.msra.mxu0 %v2376_v44 }
 0x30d   : > { %v2403_v50 = vpack.c.bf16 %v1934_v28, %v1931_v49 }
 0x30f   : > { %2404 = vmatpush1.bf16.msra.mxu1 %v2403_v50  ;;  %2078 = vmatmul.mubr.f32.vlgmr.msra.gmra.mrb[6].mxu0 %v3232_v23 }
 0x311   : > { %v1271_v6 = vpop.permute.xlu1 %1270 }
 0x312   : > { %2149 = vmatmul.mubr.f32.vlgmr.msra.gmra.mrb[6].mxu1 %v3232_v23  ;;  %v1273_v7 = vadd.f32 %v1271_v6, %v3245_v27  ;;  %v1274_v51 = vadd.f32 %v1271_v6, %v3257_v32  ;;  %v1275_v48 = vadd.f32 %v1271_v6, %v3247_v29 }
 0x314   : > { %v1278_v12 = vsel %vm1076_vm14, %v1273_v7, 0.0  ;;  %v1285_v13 = vsel %vm1076_vm14, %v1274_v51, 0.0  ;;  %v1292_v22 = vsel %vm1076_vm14, %v1275_v48, 0.0 }
 0x315   : > { %v1279_v30 = vrot.slane %v1278_v12, 4  ;;  %v1286_v53 = vrot.slane %v1285_v13, 4  ;;  %v1293_v63 = vrot.slane %v1292_v22, 4 }
 0x317   : > { %v1280_v5 = vadd.f32 %v1279_v30, %v1278_v12  ;;  %v1287_v15 = vadd.f32 %v1286_v53, %v1285_v13  ;;  %v1294_v43 = vadd.f32 %v1293_v63, %v1292_v22  ;;  %v1353_v13 = vpop.permute.xlu1 %1352 }
 0x319   : > { %v1281_v23 = vrot.slane %v1280_v5, 2  ;;  %v1288_v55 = vrot.slane %v1287_v15, 2  ;;  %v1295_v56 = vrot.slane %v1294_v43, 2 }
 0x31b   : > { %v1282_v27 = vadd.f32 %v1281_v23, %v1280_v5  ;;  %v1289_v59 = vadd.f32 %v1288_v55, %v1287_v15  ;;  %v1296_v32 = vadd.f32 %v1295_v56, %v1294_v43 }
 0x31d   : > { %v1283_v60 = vrot.slane %v1282_v27, 1  ;;  %v1290_v29 = vrot.slane %v1289_v59, 1  ;;  %v1297_v62 = vrot.slane %v1296_v32, 1 }
 0x31f   : > { %v1284_v39 = vadd.f32 %v1283_v60, %v1282_v27  ;;  %v1291_v40 = vadd.f32 %v1290_v29, %v1289_v59  ;;  %v1298_v61 = vadd.f32 %v1297_v62, %v1296_v32  ;;  %v2161_v29 = vpop.permute.xlu1 %2160 }
 0x321   : > { %v1300_v46 = vmul.f32 0.25, %v1284_v39  ;;  %v1301_v16 = vmul.f32 0.25, %v1291_v40  ;;  %v1302_v0 = vmul.f32 0.25, %v1298_v61 }
 0x323   : > { %v1303_v1 = vsub.f32 %v1273_v7, %v1300_v46  ;;  %v1304_v57 = vsub.f32 %v1274_v51, %v1301_v16  ;;  %v1305_v8 = vsub.f32 %v1275_v48, %v1302_v0  ;;  %v1345_v51 = vpop.permute.xlu0 %1344 }
 0x325   : > { %v1306_v9 = vmul.f32 %v1303_v1, %v1303_v1  ;;  %v1307_v54 = vmul.f32 %v1304_v57, %v1304_v57  ;;  %v1308_v10 = vmul.f32 %v1305_v8, %v1305_v8 }
 0x327   : > { %v1309_v4 = vsel %vm1076_vm14, %v1306_v9, 0.0  ;;  %v1316_v52 = vsel %vm1076_vm14, %v1307_v54, 0.0  ;;  %v1323_v17 = vsel %vm1076_vm14, %v1308_v10, 0.0  ;;  %v2006_v53 = vpop.permute.xlu0 %2005 }
 0x328   : > { %v1310_v18 = vrot.slane %v1309_v4, 4  ;;  %v1317_v19 = vrot.slane %v1316_v52, 4  ;;  %v1324_v20 = vrot.slane %v1323_v17, 4 }
 0x32a   : > { %v1311_v24 = vadd.f32 %v1310_v18, %v1309_v4  ;;  %v1318_v45 = vadd.f32 %v1317_v19, %v1316_v52  ;;  %v1325_v25 = vadd.f32 %v1324_v20, %v1323_v17 }
 0x32c   : > { %v1312_v26 = vrot.slane %v1311_v24, 2  ;;  %v1319_v58 = vrot.slane %v1318_v45, 2  ;;  %v1326_v37 = vrot.slane %v1325_v25, 2 }
 0x32e   : > { %v1313_v14 = vadd.f32 %v1312_v26, %v1311_v24  ;;  %v1320_v11 = vadd.f32 %v1319_v58, %v1318_v45  ;;  %v1327_v31 = vadd.f32 %v1326_v37, %v1325_v25 }
 0x330   : > { %v1314_v42 = vrot.slane %v1313_v14, 1  ;;  %v1321_v33 = vrot.slane %v1320_v11, 1  ;;  %v1328_v34 = vrot.slane %v1327_v31, 1 }
 0x332   : > { %v1315_v2 = vadd.f32 %v1314_v42, %v1313_v14  ;;  %v1322_v21 = vadd.f32 %v1321_v33, %v1320_v11  ;;  %v1329_v3 = vadd.f32 %v1328_v34, %v1327_v31 }
 0x334   : > { %v1330_v38 = vmul.f32 0.25, %v1315_v2  ;;  %v1331_v44 = vmul.f32 0.25, %v1322_v21  ;;  %v1332_v47 = vmul.f32 0.25, %v1329_v3 }
 0x336   : > { %v1333_v35 = vadd.f32 1e-05, %v1330_v38  ;;  %v1334_v41 = vadd.f32 1e-05, %v1331_v44  ;;  %v1335_v36 = vadd.f32 1e-05, %v1332_v47 }
 0x338   : > { %2620 = vrsqrt.f32 %v1333_v35 }
 0x339   : > { %2622 = vrsqrt.f32 %v1334_v41 }
 0x33a   : > { %2624 = vrsqrt.f32 %v1335_v36 }
 0x342   : > { %v2621_v49 = vpop.eup %2620 }
 0x343   : > { %v2623_v28 = vpop.eup %2622  ;;  %v1339_v6 = vmul.f32 %v2621_v49, %v1303_v1 }
 0x344   : > { %v2625_v50 = vpop.eup %2624  ;;  %v1340_v7 = vmul.f32 %v2623_v28, %v1304_v57 }
 0x345   : > { %v1341_v48 = vmul.f32 %v2625_v50, %v1305_v8  ;;  %v1347_v12 = vmul.f32 %v1345_v51, %v1339_v6 }
 0x346   : > { %v1348_v22 = vmul.f32 %v1345_v51, %v1340_v7 }
 0x347   : > { %v1349_v30 = vmul.f32 %v1345_v51, %v1341_v48  ;;  %v1355_v5 = vadd.f32 %v1353_v13, %v1347_v12 }
 0x348   : > { %v1356_v23 = vadd.f32 %v1353_v13, %v1348_v22 }
 0x349   : > { %v1357_v59 = vadd.f32 %v1353_v13, %v1349_v30 }
 0x3e2   : > { %v2079_v63 = vpop.f32.mrb[6].mxu0 }
 0x3e3   : > { %v2080_v15 = vadd.f32 %v2079_v63, %v2006_v53  ;;  %v2081_v43 = vpop.f32.mrb[7].mxu0 }
 0x3e4   : > { %v2082_v55 = vadd.f32 %v2081_v43, %v2006_v53 }
 0x3e5   : > { %v2150_v56 = vpop.f32.mrb[6].mxu1  ;;  %v2154_v27 = vmul.f32 %v2080_v15, %v1355_v5 }
 0x3e6   : > { %v2151_v32 = vadd.f32 %v2150_v56, %v2006_v53  ;;  %v2152_v60 = vpop.f32.mrb[7].mxu1  ;;  %v2155_v62 = vmul.f32 %v2082_v55, %v1356_v23 }
 0x3e7   : > { %v2163_v39 = vadd.f32 %v2161_v29, %v2154_v27 }
 0x3e8   : > { %v2156_v40 = vmul.f32 %v2151_v32, %v1357_v59  ;;  %v2164_v61 = vadd.f32 %v2161_v29, %v2155_v62 }
 0x3ea   : > { %v2165_v46 = vadd.f32 %v2161_v29, %v2156_v40  ;;  %v2168_v16 = vcombine.low %v2163_v39, %v2164_v61 }
 0x3ec   : > { %2171 = vst [vmem:[%s440_s17 + $0x8] sm:$0xf] %v2165_v46  ;;  %2170 = vst [vmem:[%s440_s17] sm:$0xff] %v2168_v16 }
 0x3ed PF: > { %s23_s25 = sadd.s32 1, %s2632_s25  }
 0x3ee   : > { %p20_p4 = scmp.ge.s32.totalorder %s23_s25, 4  }
 0x3f0   :  { %22 = sbr.rel (!%p20_p4) target bundleno = 1 (0x1), region = 102 }

</bundles_post_ra>
